<compile_context>
chip_gen: v7x
topology: tpu7x:2x2x1
jax: 0.10.0
libtpu: 0.0.40
codegen_flags: <defaults>
</compile_context>

<pallas_src>
import functools

import jax
import jax.numpy as jnp
from jax import lax
from jax.experimental import pallas as pl
from jax.experimental.pallas import tpu as pltpu


def _residual_cnn_kernel(x_ref, gamma_ref, beta_ref, w_ref, b_ref, o_ref, *,
                         F, T, K, eps, compute_dtype):
    # x_ref:     (BB, C, F*T)      lane-dense input block (F-major, T-minor on the lane axis)
    # gamma_ref: (F, 1)  beta_ref: (F, 1)   LayerNorm affine params (f32)
    # w_ref:     (Cout, K*K*Cin)   conv weight, column order (kh, kw, ci), compute dtype
    # b_ref:     (Cout, 1)         conv bias (f32)
    # o_ref:     (BB, Cout, F*T)   lane-dense output block
    BB, C, FT = x_ref.shape
    Cout = o_ref.shape[1]
    p = K // 2
    N = BB * FT

    # ---- channel-major activation: single major-dim transpose ----
    x_cm = jnp.transpose(x_ref[...], (1, 0, 2))               # (C, BB, FT)

    # ---- LayerNorm over F (n_feats), per (c, bb, t); biased variance like PyTorch ----
    xln = x_cm.reshape(C * BB, F, T).astype(jnp.float32)
    mean = jnp.mean(xln, axis=1, keepdims=True)
    cent = xln - mean
    var = jnp.mean(cent * cent, axis=1, keepdims=True)
    gamma = gamma_ref[...][None, :, :]                         # (1, F, 1)
    beta = beta_ref[...][None, :, :]
    xn = cent * lax.rsqrt(var + eps) * gamma + beta            # (C*BB, F, T)
    xn_cm = xn.reshape(C, N)                                   # f32 residual, channel-major

    # ---- ReLU; Dropout(p=0.2) is identity in eval mode ----
    # TODO(synk): training-mode dropout (random mask + 1/(1-p) scale) not implemented.
    h = jnp.maximum(xn_cm, 0.0).astype(compute_dtype)          # (C, N), single cast

    # ---- im2col via XLU lane rolls + boundary masks (no padded scratch, no strided slices) ----
    f_iota = lax.broadcasted_iota(jnp.int32, (BB, F, T), 1).reshape(1, N)
    t_iota = lax.broadcasted_iota(jnp.int32, (BB, F, T), 2).reshape(1, N)

    taps = []
    for kh in range(K):
        dh = kh - p
        for kw in range(K):
            dw = kw - p
            d = dh * T + dw
            rolled = h if d == 0 else pltpu.roll(h, shift=(-d) % N, axis=1)
            conds = []
            if dh < 0:
                conds.append(f_iota >= -dh)
            if dh > 0:
                conds.append(f_iota < F - dh)
            if dw < 0:
                conds.append(t_iota >= -dw)
            if dw > 0:
                conds.append(t_iota < T - dw)
            if conds:
                m = conds[0]
                for cnd in conds[1:]:
                    m = m & cnd
                rolled = jnp.where(m, rolled, jnp.zeros_like(rolled))
            taps.append(rolled)
    col = jnp.concatenate(taps, axis=0)                        # (K*K*C, N), rows (kh, kw, ci)

    # ---- single MXU matmul for the whole batch block (f32 accumulation) ----
    conv = jnp.dot(w_ref[...], col, preferred_element_type=jnp.float32)   # (Cout, N)

    # ---- one wide lane-dense epilogue: conv + bias + residual, then one major transpose out ----
    out_cm = conv + b_ref[...] + xn_cm                          # (Cout, N); Cin == Cout
    out = jnp.transpose(out_cm.reshape(Cout, BB, FT), (1, 0, 2))
    o_ref[...] = out.astype(o_ref.dtype)


def _vmem_capacity_bytes():
    try:
        info = pltpu.get_tpu_info()
        for name in ("vmem_capacity_bytes", "vmem_size_bytes", "vmem_bytes"):
            v = getattr(info, name, None)
            if v:
                return int(v)
    except Exception:
        pass
    return 64 * 1024 * 1024   # conservative default (v7x per-core VMEM)


def _per_sample_vmem_bytes(C, Cout, FT, K, in_dtype, out_dtype, compute_dtype):
    isz = jnp.dtype(in_dtype).itemsize
    osz = jnp.dtype(out_dtype).itemsize
    csz = jnp.dtype(compute_dtype).itemsize
    byt = 2 * C * FT * isz            # double-buffered input block
    byt += 2 * Cout * FT * osz        # double-buffered output block
    byt += 2 * C * FT * 4             # f32 LN intermediates + residual
    byt += C * FT * csz               # ReLU'd activation
    byt += K * K * C * FT * csz       # im2col value
    byt += 2 * Cout * FT * 4          # f32 conv result + epilogue
    return 2 * byt                    # safety factor for compiler temporaries / relayouts


def _pick_batch_block(B, C, Cout, FT, K, in_dtype, out_dtype, compute_dtype,
                      vmem_budget_bytes, target_dma_bytes=512 * 1024):
    per_sample = _per_sample_vmem_bytes(C, Cout, FT, K, in_dtype, out_dtype, compute_dtype)
    in_bytes = max(1, C * FT * jnp.dtype(in_dtype).itemsize)
    bb = max(1, min(vmem_budget_bytes // per_sample,            # per-generation VMEM budget
                    max(1, target_dma_bytes // in_bytes)))      # >= ~0.5 MiB input DMA per step
    bb = min(bb, max(1, B))
    if B >= 2:
        bb = min(bb, -(-B // 2))      # keep >= 2 grid steps (both v7x TensorCores busy)
    return max(1, int(bb))


def residual_cnn(x, gamma, beta, w, b, *, eps=1e-5, compute_dtype=jnp.bfloat16,
                 batch_block=None):
    """x: (B, C, F, T); gamma/beta: (F,); w: (Cout, Cin, K, K); b: (Cout,)."""
    B, C, F, T = x.shape
    Cout, Cin, K, K2 = w.shape
    assert K == K2 and Cin == C and Cout == C, "residual add requires in_channels == out_channels"
    FT = F * T
    out_dtype = x.dtype

    vmem_cap = _vmem_capacity_bytes()
    if batch_block is None:
        BB = _pick_batch_block(B, C, Cout, FT, K, x.dtype, out_dtype, compute_dtype,
                               vmem_budget_bytes=int(vmem_cap * 0.6))
    else:
        BB = max(1, int(batch_block))
    B_pad = (-(-B // BB)) * BB        # pad batch instead of shrinking BB for awkward B

    # glue: lane-dense input / output, flattened weight taps (kh, kw, ci) on the contraction axis
    x_flat = x.reshape(B, C, FT)
    if B_pad != B:
        x_flat = jnp.pad(x_flat, ((0, B_pad - B), (0, 0), (0, 0)))
    w_flat = jnp.transpose(w, (0, 2, 3, 1)).reshape(Cout, K * K * Cin).astype(compute_dtype)
    gamma2 = gamma.reshape(F, 1).astype(jnp.float32)
    beta2 = beta.reshape(F, 1).astype(jnp.float32)
    b2 = b.reshape(Cout, 1).astype(jnp.float32)

    kernel = functools.partial(_residual_cnn_kernel, F=F, T=T, K=K, eps=eps,
                               compute_dtype=compute_dtype)
    out_flat = pl.pallas_call(
        kernel,
        out_shape=jax.ShapeDtypeStruct((B_pad, Cout, FT), out_dtype),
        grid_spec=pltpu.PrefetchScalarGridSpec(
            num_scalar_prefetch=0,
            grid=(B_pad // BB,),
            in_specs=[
                pl.BlockSpec((BB, C, FT), lambda bi: (bi, 0, 0)),
                pl.BlockSpec((F, 1), lambda bi: (0, 0)),
                pl.BlockSpec((F, 1), lambda bi: (0, 0)),
                pl.BlockSpec((Cout, K * K * Cin), lambda bi: (0, 0)),
                pl.BlockSpec((Cout, 1), lambda bi: (0, 0)),
            ],
            out_specs=pl.BlockSpec((BB, Cout, FT), lambda bi: (bi, 0, 0)),
        ),
        compiler_params=pltpu.CompilerParams(
            dimension_semantics=("parallel",),
            vmem_limit_bytes=max(32 * 1024 * 1024, int(vmem_cap * 0.75)),
        ),
    )(x_flat, gamma2, beta2, w_flat, b2)

    if B_pad != B:
        out_flat = out_flat[:B]
    return out_flat.reshape(B, Cout, F, T)


def _reference(x, gamma, beta, w, b, eps=1e-5):
    # LayerNorm over axis 2 (n_feats), matching x.permute(0,1,3,2) -> LN(last) -> permute back
    K = w.shape[2]
    p = K // 2
    xp = jnp.transpose(x, (0, 1, 3, 2))                    # (B, C, T, F)
    mean = xp.mean(-1, keepdims=True)
    var = ((xp - mean) ** 2).mean(-1, keepdims=True)
    xn = (xp - mean) / jnp.sqrt(var + eps) * gamma + beta
    xn = jnp.transpose(xn, (0, 1, 3, 2))                   # (B, C, F, T)
    h = jnp.maximum(xn, 0.0)
    conv = jax.lax.conv_general_dilated(
        h, w, window_strides=(1, 1), padding=[(p, p), (p, p)],
        dimension_numbers=("NCHW", "OIHW", "NCHW"))
    return conv + b[None, :, None, None] + xn


if __name__ == "__main__":
    B, C, F, T, K = 2, 4, 16, 16, 3   # batch, channels(in=out), n_feats, time, kernel

    key = jax.random.PRNGKey(0)
    kx, kg, kb, kw, kc = jax.random.split(key, 5)
    x = jax.random.normal(kx, (B, C, F, T), dtype=jnp.float32)
    gamma = 1.0 + 0.1 * jax.random.normal(kg, (F,), dtype=jnp.float32)
    beta = 0.1 * jax.random.normal(kb, (F,), dtype=jnp.float32)
    w = 0.1 * jax.random.normal(kw, (C, C, K, K), dtype=jnp.float32)
    b = 0.1 * jax.random.normal(kc, (C,), dtype=jnp.float32)

    ref = jax.block_until_ready(_reference(x, gamma, beta, w, b))

    # Exact-parity path: f32 matmul operands.
    out_f32 = jax.block_until_ready(
        residual_cnn(x, gamma, beta, w, b, compute_dtype=jnp.float32))
    assert out_f32.shape == (B, C, F, T) and out_f32.dtype == x.dtype
    assert jnp.allclose(out_f32, ref, atol=1e-4, rtol=1e-4), float(jnp.max(jnp.abs(out_f32 - ref)))

    # Default performance path: bf16 matmul operands, f32 accumulation.
    out_bf16 = jax.block_until_ready(residual_cnn(x, gamma, beta, w, b))
    assert out_bf16.shape == (B, C, F, T) and out_bf16.dtype == x.dtype
    assert jnp.allclose(out_bf16, ref, atol=3e-2, rtol=3e-2), float(jnp.max(jnp.abs(out_bf16 - ref)))

    # Padded-batch path: B not divisible by the batch block (BB=2 over B=3 -> zero-pad to 4).
    B2 = 3
    x2 = jax.random.normal(kx, (B2, C, F, T), dtype=jnp.float32)
    ref2 = jax.block_until_ready(_reference(x2, gamma, beta, w, b))
    out2 = jax.block_until_ready(
        residual_cnn(x2, gamma, beta, w, b, compute_dtype=jnp.float32, batch_block=2))
    assert out2.shape == (B2, C, F, T)
    assert jnp.allclose(out2, ref2, atol=1e-4, rtol=1e-4), float(jnp.max(jnp.abs(out2 - ref2)))

    print("KERNEL_OK")
</pallas_src>

<mosaic_0001>
module attributes {stable_mosaic.version = 11 : i64} {
  func.func @_residual_cnn_kernel(%arg0: i32, %arg1: memref<1x4x256xf32, #tpu.memory_space<vmem>>, %arg2: memref<16x1xf32, #tpu.memory_space<vmem>>, %arg3: memref<16x1xf32, #tpu.memory_space<vmem>>, %arg4: memref<4x36xf32, #tpu.memory_space<vmem>>, %arg5: memref<4x1xf32, #tpu.memory_space<vmem>>, %arg6: memref<1x4x256xf32, #tpu.memory_space<vmem>>) attributes {dimension_semantics = [#tpu.dimension_semantics<parallel>], iteration_bounds = array<i64: 2>, scalar_prefetch = 0 : i64, scratch_operands = 0 : i64, tpu.core_type = #tpu.core_type<tc>, window_params = [{transform_indices = @transform_0, window_bounds = array<i64: 1, 4, 256>}, {pipeline_mode = #tpu.pipeline_mode<synchronous>, transform_indices = @transform_1, window_bounds = array<i64: 16, 1>}, {pipeline_mode = #tpu.pipeline_mode<synchronous>, transform_indices = @transform_2, window_bounds = array<i64: 16, 1>}, {pipeline_mode = #tpu.pipeline_mode<synchronous>, transform_indices = @transform_3, window_bounds = array<i64: 4, 36>}, {pipeline_mode = #tpu.pipeline_mode<synchronous>, transform_indices = @transform_4, window_bounds = array<i64: 4, 1>}, {transform_indices = @transform_5, window_bounds = array<i64: 1, 4, 256>}]} {
    %c0 = arith.constant 0 : index
    %c0_0 = arith.constant 0 : index
    %c0_1 = arith.constant 0 : index
    %0 = vector.load %arg1[%c0, %c0_0, %c0_1] : memref<1x4x256xf32, #tpu.memory_space<vmem>>, vector<1x4x256xf32>
    %1 = tpu.transpose %0, [1, 0, 2] : vector<1x4x256xf32> -> vector<4x1x256xf32>
    %2 = vector.shape_cast %1 : vector<4x1x256xf32> to vector<4x16x16xf32>
    %cst = arith.constant dense<0.000000e+00> : vector<4x16xf32>
    %3 = vector.multi_reduction <add>, %2, %cst [1] : vector<4x16x16xf32> to vector<4x16xf32>
    %4 = vector.shape_cast %3 : vector<4x16xf32> to vector<4x1x16xf32>
    %cst_2 = arith.constant 1.600000e+01 : f32
    %5 = vector.broadcast %cst_2 : f32 to vector<4x1x16xf32>
    %6 = arith.divf %4, %5 : vector<4x1x16xf32>
    %7 = vector.broadcast %6 : vector<4x1x16xf32> to vector<4x16x16xf32>
    %8 = arith.subf %2, %7 : vector<4x16x16xf32>
    %9 = arith.mulf %8, %8 : vector<4x16x16xf32>
    %cst_3 = arith.constant dense<0.000000e+00> : vector<4x16xf32>
    %10 = vector.multi_reduction <add>, %9, %cst_3 [1] : vector<4x16x16xf32> to vector<4x16xf32>
    %11 = vector.shape_cast %10 : vector<4x16xf32> to vector<4x1x16xf32>
    %cst_4 = arith.constant 1.600000e+01 : f32
    %12 = vector.broadcast %cst_4 : f32 to vector<4x1x16xf32>
    %13 = arith.divf %11, %12 : vector<4x1x16xf32>
    %c0_5 = arith.constant 0 : index
    %c0_6 = arith.constant 0 : index
    %14 = vector.load %arg2[%c0_5, %c0_6] : memref<16x1xf32, #tpu.memory_space<vmem>>, vector<16x1xf32>
    %15 = vector.shape_cast %14 : vector<16x1xf32> to vector<1x16x1xf32>
    %c0_7 = arith.constant 0 : index
    %c0_8 = arith.constant 0 : index
    %16 = vector.load %arg3[%c0_7, %c0_8] : memref<16x1xf32, #tpu.memory_space<vmem>>, vector<16x1xf32>
    %17 = vector.shape_cast %16 : vector<16x1xf32> to vector<1x16x1xf32>
    %cst_9 = arith.constant 9.99999974E-6 : f32
    %18 = vector.broadcast %cst_9 : f32 to vector<4x1x16xf32>
    %19 = arith.addf %13, %18 : vector<4x1x16xf32>
    %20 = math.rsqrt %19 : vector<4x1x16xf32>
    %21 = vector.broadcast %20 : vector<4x1x16xf32> to vector<4x16x16xf32>
    %22 = arith.mulf %8, %21 : vector<4x16x16xf32>
    %23 = vector.broadcast %15 : vector<1x16x1xf32> to vector<4x16x16xf32>
    %24 = arith.mulf %22, %23 : vector<4x16x16xf32>
    %25 = vector.broadcast %17 : vector<1x16x1xf32> to vector<4x16x16xf32>
    %26 = arith.addf %24, %25 : vector<4x16x16xf32>
    %27 = vector.shape_cast %26 : vector<4x16x16xf32> to vector<4x256xf32>
    %cst_10 = arith.constant 0.000000e+00 : f32
    %28 = vector.broadcast %cst_10 : f32 to vector<4x256xf32>
    %29 = arith.maximumf %27, %28 : vector<4x256xf32>
    %30 = tpu.iota {dimensions = array<i32: 1>} : vector<1x16x16xi32>
    %31 = vector.shape_cast %30 : vector<1x16x16xi32> to vector<1x256xi32>
    %32 = tpu.iota {dimensions = array<i32: 2>} : vector<1x16x16xi32>
    %33 = vector.shape_cast %32 : vector<1x16x16xi32> to vector<1x256xi32>
    %c17_i32 = arith.constant 17 : i32
    %34 = tpu.dynamic_rotate %29 by %c17_i32 dim 1 : vector<4x256xf32>, i32 -> vector<4x256xf32>
    %c1_i32 = arith.constant 1 : i32
    %35 = vector.broadcast %c1_i32 : i32 to vector<1x256xi32>
    %36 = arith.cmpi sge, %31, %35 : vector<1x256xi32>
    %c1_i32_11 = arith.constant 1 : i32
    %37 = vector.broadcast %c1_i32_11 : i32 to vector<1x256xi32>
    %38 = arith.cmpi sge, %33, %37 : vector<1x256xi32>
    %39 = arith.andi %36, %38 : vector<1x256xi1>
    %cst_12 = arith.constant 0.000000e+00 : f32
    %40 = vector.broadcast %cst_12 : f32 to vector<4x256xf32>
    %41 = vector.shape_cast %39 : vector<1x256xi1> to vector<1x256xi1>
    %42 = vector.broadcast %41 : vector<1x256xi1> to vector<4x256xi1>
    %43 = arith.select %42, %34, %40 : vector<4x256xi1>, vector<4x256xf32>
    %c16_i32 = arith.constant 16 : i32
    %44 = tpu.dynamic_rotate %29 by %c16_i32 dim 1 : vector<4x256xf32>, i32 -> vector<4x256xf32>
    %c1_i32_13 = arith.constant 1 : i32
    %45 = vector.broadcast %c1_i32_13 : i32 to vector<1x256xi32>
    %46 = arith.cmpi sge, %31, %45 : vector<1x256xi32>
    %cst_14 = arith.constant 0.000000e+00 : f32
    %47 = vector.broadcast %cst_14 : f32 to vector<4x256xf32>
    %48 = vector.shape_cast %46 : vector<1x256xi1> to vector<1x256xi1>
    %49 = vector.broadcast %48 : vector<1x256xi1> to vector<4x256xi1>
    %50 = arith.select %49, %44, %47 : vector<4x256xi1>, vector<4x256xf32>
    %c15_i32 = arith.constant 15 : i32
    %51 = tpu.dynamic_rotate %29 by %c15_i32 dim 1 : vector<4x256xf32>, i32 -> vector<4x256xf32>
    %c1_i32_15 = arith.constant 1 : i32
    %52 = vector.broadcast %c1_i32_15 : i32 to vector<1x256xi32>
    %53 = arith.cmpi sge, %31, %52 : vector<1x256xi32>
    %c15_i32_16 = arith.constant 15 : i32
    %54 = vector.broadcast %c15_i32_16 : i32 to vector<1x256xi32>
    %55 = arith.cmpi slt, %33, %54 : vector<1x256xi32>
    %56 = arith.andi %53, %55 : vector<1x256xi1>
    %cst_17 = arith.constant 0.000000e+00 : f32
    %57 = vector.broadcast %cst_17 : f32 to vector<4x256xf32>
    %58 = vector.shape_cast %56 : vector<1x256xi1> to vector<1x256xi1>
    %59 = vector.broadcast %58 : vector<1x256xi1> to vector<4x256xi1>
    %60 = arith.select %59, %51, %57 : vector<4x256xi1>, vector<4x256xf32>
    %c1_i32_18 = arith.constant 1 : i32
    %61 = tpu.dynamic_rotate %29 by %c1_i32_18 dim 1 : vector<4x256xf32>, i32 -> vector<4x256xf32>
    %c1_i32_19 = arith.constant 1 : i32
    %62 = vector.broadcast %c1_i32_19 : i32 to vector<1x256xi32>
    %63 = arith.cmpi sge, %33, %62 : vector<1x256xi32>
    %cst_20 = arith.constant 0.000000e+00 : f32
    %64 = vector.broadcast %cst_20 : f32 to vector<4x256xf32>
    %65 = vector.shape_cast %63 : vector<1x256xi1> to vector<1x256xi1>
    %66 = vector.broadcast %65 : vector<1x256xi1> to vector<4x256xi1>
    %67 = arith.select %66, %61, %64 : vector<4x256xi1>, vector<4x256xf32>
    %c255_i32 = arith.constant 255 : i32
    %68 = tpu.dynamic_rotate %29 by %c255_i32 dim 1 : vector<4x256xf32>, i32 -> vector<4x256xf32>
    %c15_i32_21 = arith.constant 15 : i32
    %69 = vector.broadcast %c15_i32_21 : i32 to vector<1x256xi32>
    %70 = arith.cmpi slt, %33, %69 : vector<1x256xi32>
    %cst_22 = arith.constant 0.000000e+00 : f32
    %71 = vector.broadcast %cst_22 : f32 to vector<4x256xf32>
    %72 = vector.shape_cast %70 : vector<1x256xi1> to vector<1x256xi1>
    %73 = vector.broadcast %72 : vector<1x256xi1> to vector<4x256xi1>
    %74 = arith.select %73, %68, %71 : vector<4x256xi1>, vector<4x256xf32>
    %c241_i32 = arith.constant 241 : i32
    %75 = tpu.dynamic_rotate %29 by %c241_i32 dim 1 : vector<4x256xf32>, i32 -> vector<4x256xf32>
    %c15_i32_23 = arith.constant 15 : i32
    %76 = vector.broadcast %c15_i32_23 : i32 to vector<1x256xi32>
    %77 = arith.cmpi slt, %31, %76 : vector<1x256xi32>
    %c1_i32_24 = arith.constant 1 : i32
    %78 = vector.broadcast %c1_i32_24 : i32 to vector<1x256xi32>
    %79 = arith.cmpi sge, %33, %78 : vector<1x256xi32>
    %80 = arith.andi %77, %79 : vector<1x256xi1>
    %cst_25 = arith.constant 0.000000e+00 : f32
    %81 = vector.broadcast %cst_25 : f32 to vector<4x256xf32>
    %82 = vector.shape_cast %80 : vector<1x256xi1> to vector<1x256xi1>
    %83 = vector.broadcast %82 : vector<1x256xi1> to vector<4x256xi1>
    %84 = arith.select %83, %75, %81 : vector<4x256xi1>, vector<4x256xf32>
    %c240_i32 = arith.constant 240 : i32
    %85 = tpu.dynamic_rotate %29 by %c240_i32 dim 1 : vector<4x256xf32>, i32 -> vector<4x256xf32>
    %c15_i32_26 = arith.constant 15 : i32
    %86 = vector.broadcast %c15_i32_26 : i32 to vector<1x256xi32>
    %87 = arith.cmpi slt, %31, %86 : vector<1x256xi32>
    %cst_27 = arith.constant 0.000000e+00 : f32
    %88 = vector.broadcast %cst_27 : f32 to vector<4x256xf32>
    %89 = vector.shape_cast %87 : vector<1x256xi1> to vector<1x256xi1>
    %90 = vector.broadcast %89 : vector<1x256xi1> to vector<4x256xi1>
    %91 = arith.select %90, %85, %88 : vector<4x256xi1>, vector<4x256xf32>
    %c239_i32 = arith.constant 239 : i32
    %92 = tpu.dynamic_rotate %29 by %c239_i32 dim 1 : vector<4x256xf32>, i32 -> vector<4x256xf32>
    %c15_i32_28 = arith.constant 15 : i32
    %93 = vector.broadcast %c15_i32_28 : i32 to vector<1x256xi32>
    %94 = arith.cmpi slt, %31, %93 : vector<1x256xi32>
    %c15_i32_29 = arith.constant 15 : i32
    %95 = vector.broadcast %c15_i32_29 : i32 to vector<1x256xi32>
    %96 = arith.cmpi slt, %33, %95 : vector<1x256xi32>
    %97 = arith.andi %94, %96 : vector<1x256xi1>
    %cst_30 = arith.constant 0.000000e+00 : f32
    %98 = vector.broadcast %cst_30 : f32 to vector<4x256xf32>
    %99 = vector.shape_cast %97 : vector<1x256xi1> to vector<1x256xi1>
    %100 = vector.broadcast %99 : vector<1x256xi1> to vector<4x256xi1>
    %101 = arith.select %100, %92, %98 : vector<4x256xi1>, vector<4x256xf32>
    %102 = tpu.concatenate %43, %50, %60, %67, %29, %74, %84, %91, %101 in 0 : vector<4x256xf32>, vector<4x256xf32>, vector<4x256xf32>, vector<4x256xf32>, vector<4x256xf32>, vector<4x256xf32>, vector<4x256xf32>, vector<4x256xf32>, vector<4x256xf32> -> vector<36x256xf32>
    %c0_31 = arith.constant 0 : index
    %c0_32 = arith.constant 0 : index
    %103 = vector.load %arg4[%c0_31, %c0_32] : memref<4x36xf32, #tpu.memory_space<vmem>>, vector<4x36xf32>
    %cst_33 = arith.constant dense<0.000000e+00> : vector<4x256xf32>
    %104 = tpu.matmul %103, %102, %cst_33 {dimension_numbers = #tpu.dot_dimension_numbers<[1], [0], [0], [1], [0, 0, 1, 1], [], []>} : vector<4x36xf32>, vector<36x256xf32>, vector<4x256xf32> -> vector<4x256xf32>
    %c0_34 = arith.constant 0 : index
    %c0_35 = arith.constant 0 : index
    %105 = vector.load %arg5[%c0_34, %c0_35] : memref<4x1xf32, #tpu.memory_space<vmem>>, vector<4x1xf32>
    %106 = vector.broadcast %105 : vector<4x1xf32> to vector<4x256xf32>
    %107 = arith.addf %104, %106 : vector<4x256xf32>
    %108 = arith.addf %107, %27 : vector<4x256xf32>
    %109 = vector.shape_cast %108 : vector<4x256xf32> to vector<4x1x256xf32>
    %110 = tpu.transpose %109, [1, 0, 2] : vector<4x1x256xf32> -> vector<1x4x256xf32>
    %c0_36 = arith.constant 0 : index
    %c0_37 = arith.constant 0 : index
    %c0_38 = arith.constant 0 : index
    %111 = vector.load %arg6[%c0_36, %c0_37, %c0_38] : memref<1x4x256xf32, #tpu.memory_space<vmem>>, vector<1x4x256xf32>
    tpu.vector_store %arg6[%c0_36, %c0_37, %c0_38], %110 {strides = array<i32>} : memref<1x4x256xf32, #tpu.memory_space<vmem>>, vector<1x4x256xf32>,
    return
  }
  func.func @transform_0(%arg0: i32) -> (i32, i32, i32) {
    %c0_i32 = arith.constant 0 : i32
    %c0_i32_0 = arith.constant 0 : i32
    %c0_i32_1 = arith.constant 0 : i32
    return %arg0, %c0_i32, %c0_i32_0 : i32, i32, i32
  }
  func.func @transform_1(%arg0: i32) -> (i32, i32) {
    %c0_i32 = arith.constant 0 : i32
    %c0_i32_0 = arith.constant 0 : i32
    %c0_i32_1 = arith.constant 0 : i32
    return %c0_i32, %c0_i32_0 : i32, i32
  }
  func.func @transform_2(%arg0: i32) -> (i32, i32) {
    %c0_i32 = arith.constant 0 : i32
    %c0_i32_0 = arith.constant 0 : i32
    %c0_i32_1 = arith.constant 0 : i32
    return %c0_i32, %c0_i32_0 : i32, i32
  }
  func.func @transform_3(%arg0: i32) -> (i32, i32) {
    %c0_i32 = arith.constant 0 : i32
    %c0_i32_0 = arith.constant 0 : i32
    %c0_i32_1 = arith.constant 0 : i32
    return %c0_i32, %c0_i32_0 : i32, i32
  }
  func.func @transform_4(%arg0: i32) -> (i32, i32) {
    %c0_i32 = arith.constant 0 : i32
    %c0_i32_0 = arith.constant 0 : i32
    %c0_i32_1 = arith.constant 0 : i32
    return %c0_i32, %c0_i32_0 : i32, i32
  }
  func.func @transform_5(%arg0: i32) -> (i32, i32, i32) {
    %c0_i32 = arith.constant 0 : i32
    %c0_i32_0 = arith.constant 0 : i32
    %c0_i32_1 = arith.constant 0 : i32
    return %arg0, %c0_i32, %c0_i32_0 : i32, i32, i32
  }
}

</mosaic_0001>

<bundles_post_ra>
// kernel: tpu_custom_call.1
= control target key start
LH: loop header
LB: loop body
LE: loop exit
PB: predicated region body
PF: predicated region fallthrough
CT: control target
= control target key end

     0   :  { %10 = vsyncpa [#allocation3], 0  ;;  %s3111_s0 = inlined_call_operand.vmem [shape: f32[2,4,256], index: 0, kind: input, shape index: {}]   ;;  %s3112_s1 = inlined_call_operand.vmem [shape: f32[16,1], index: 1, kind: input, shape index: {}]   ;;  %s3113_s2 = inlined_call_operand.vmem [shape: f32[16,1], index: 2, kind: input, shape index: {}]   ;;  %s3114_s3 = inlined_call_operand.vmem [shape: f32[4,36], index: 3, kind: input, shape index: {}]   ;;  %s3115_s4 = inlined_call_operand.vmem [shape: f32[4,1], index: 4, kind: input, shape index: {}]   ;;  %s3116_s5 = inlined_call_operand.hbm [shape: f32[2,4,256], index: 5, kind: output, shape index: {}]  }
   0x1   :  { %12 = vsyncpa [#allocation3 + $0x1], 0  ;;  %s2249_s18 = smov 0   ;;  %s2251_s19 = smov 0  }
   0x2   :  { %s2253_s20 = smov 0   ;;  %s2255_s21 = smov 0  }
   0x3 LB: > { %s2270_s22 = sadd.s32 4294967295, %s2195_s21   ;;  %s2000_s23 = sadd.s32 4294967294, %s2195_s21   ;;  %s2195_s21 = sphi %s2255_s21, %s3158_s21   ;;  %s2191_s20 = sphi %s2253_s20, %s3157_s20   ;;  %s2187_s19 = sphi %s2251_s19, %s3156_s19   ;;  %s2183_s18 = sphi %s2249_s18, %s3155_s18  }
   0x4   : > { %s2274_s24 = sadd.s32 1, %s2195_s21   ;;  %s135_s25 = sadd.s32 1, %s2191_s20 }
   0x5   : > { %s132_s26 = ssub.s32 %s2195_s21, %s2274_s24  ;;  %p145_p0 = scmp.ne.s32.totalorder %s2191_s20, %s2187_s19 }
   0x6   : > { %p133_p1 = scmp.eq.s32.totalorder %s132_s26, 0  ;;  %p146_p2 = scmp.eq.s32.totalorder %s2270_s22, 1 }
   0x7   : > { %p151_p3 = scmp.ne.s32.totalorder %s2187_s19, %s2183_s18  ;;  %p152_p4 = scmp.eq.s32.totalorder %s2000_s23, 1 }
   0x8   : > { %s2285_s27 = scalar_select %p133_p1, %s2191_s20, %s135_s25  }
   0x9   : > { %p2287_p5 = por %p146_p2, %p145_p0  ;;  %p2291_p6 = por %p152_p4, %p151_p3 }
   0xa   : > { %p2003_p7 = scmp.ge.s32.totalorder %s2195_s21, 1  ;;  %p190_p8 = scmp.lt.s32.totalorder %s2195_s21, 3 }
   0xc   : > { %p191_p9 = pnand %p2003_p7, %p190_p8 }
   0xd   : > { %p218_p10 = scmp.lt.s32.totalorder (!%p191_p9), %s2270_s22, 1  ;;  %v228_v0 = vlaneseq (!%p191_p9)  ;;  %v2197_v1 = vmov (!%p191_p9), 1983009808   ;;  %v2198_v3 = vmov (!%p191_p9), 1934713408   ;;  %v2199_v5 = vmov (!%p191_p9), 0.0  }
   0xe   : > { %194 = sbr.rel (%p191_p9) target bundleno = 819 (0x333), region = 40  ;;  %v226_v2 = vunpack.c.l.s4 (!%p191_p9), %v2197_v1  ;;  %v241_v4 = vunpack.c.l.s4 (!%p191_p9), %v2198_v3  ;;  %1864 = vmatprep.mubr.f32.mxu0 (!%p191_p9), %v2199_v5  ;;  %v2200_v7 = vmov (!%p191_p9), 0   ;;  %s2201_s10 = smov (!%p191_p9), 96   ;;  %v999_v26 = vld [vmem:[%s3112_s1] sm:$0xff] (!%p191_p9)  ;;  %v1000_v27 = vld [vmem:[%s3112_s1 + $0x8] sm:$0xff] (!%p191_p9)  ;;  %vm841_vm0 = vcmask (!%p191_p9), 130048  }
   0xf   : > { %v2301_v6 = vshrl.u32 (!%p191_p9), %v228_v0, 7  ;;  %2089 = vset.pattern.permute.xlu1 (!%p191_p9), %v2200_v7  ;;  %2088 = vset.pattern.permute.xlu0 (!%p191_p9), %v2200_v7  ;;  %s2202_s11 = smov (!%p191_p9), 112   ;;  %s2203_s12 = smov (!%p191_p9), 80   ;;  %v1002_v28 = vld [vmem:[%s3113_s2 + $0x8] sm:$0xff] (!%p191_p9)  ;;  %v1001_v29 = vld [vmem:[%s3113_s2] sm:$0xff] (!%p191_p9)  ;;  %vm1344_vm1 = vcmask (!%p191_p9), 261120  }
  0x10   : > { %v227_v8 = vunpack.c.0.s8 (!%p191_p9), %v226_v2  ;;  %v242_v9 = vunpack.c.0.s8 (!%p191_p9), %v241_v4  ;;  %s2204_s13 = smov (!%p191_p9), 64   ;;  %s2205_s14 = smov (!%p191_p9), 48   ;;  %vm1346_vm2 = vcmask (!%p191_p9), 392192   ;;  %vm1348_vm3 = vcmask (!%p191_p9), 523264  }
  0x11   : > { %s2206_s15 = smov (!%p191_p9), 32   ;;  %s2207_s16 = smov (!%p191_p9), 16   ;;  %vm1350_vm4 = vcmask (!%p191_p9), 654336   ;;  %vm1352_vm5 = vcmask (!%p191_p9), 785408   ;;  %vm1354_vm6 = vcmask (!%p191_p9), 916480  }
  0x12   : > { %v2309_v10 = vsub.s32 (!%p191_p9), %v227_v8, %v2301_v6  ;;  %v2312_v11 = vsub.s32 (!%p191_p9), %v242_v9, %v2301_v6  ;;  %s215_s25 = sand.u32 (!%p191_p9), 1, %s2187_s19  }
  0x13   : > { %s2004_s26 = sshll.u32 (!%p191_p9), %s215_s25, 3 }
  0x15   : > { %s219_s30 = scalar_select %p218_p10, %s2270_s22, 1 }
  0x17   : > { %s2018_s6 = sshll.u32 %s219_s30, 3  ;;  %s2019_s30 = sshll.u32 %s2270_s22, 7 }
  0x18   : > { %s222_s9 = scalar_lea.vmem %s3111_s0, %s2018_s6  ;;  %s217_s6 = scalar_lea.vmem [#allocation2], %s2004_s26 }
  0x19   : > { %v223_v12 = vld [vmem:[%s222_s9] sm:$0xff]  ;;  %s2210_s9 = smov 1   ;;  %s1941_s7 = sshll.u32 %s217_s6, 4  ;;  %s3071_s7 = int_to_ptr.vmem [resolvable:$true] %s1941_s7 }
  0x1a   : > { %v224_v13 = vcombine.high %v223_v12, %v2199_v5  ;;  %v231_v14 = vrot.slane %v223_v12, %v2309_v10  ;;  %s2218_s22 = smov [#allocation2]  }
  0x1c   : > { %v238_v15 = vrot.slane %v224_v13, %v2309_v10  ;;  %v2318_v16 = vrot.slane %v231_v14, %v2312_v11  ;;  %v239_v18 = vcombine.high %v231_v14, %v2199_v5 }
  0x1e   : > { %v261_v17 = vrot.slane %v238_v15, %v2312_v11  ;;  %v254_v19 = vcombine.high %v238_v15, %v2199_v5  ;;  %v2334_v22 = vrot.slane %v239_v18, %v2312_v11 }
  0x20   : > { %v2324_v20 = vcombine.high %v2318_v16, %v261_v17  ;;  %v2327_v21 = vcombine.low %v2318_v16, %v261_v17  ;;  %v268_v23 = vrot.slane %v254_v19, %v2312_v11 }
  0x22   : > { %303 = vrot.lane.b32.xlu1 %v2324_v20, %s2201_s10  ;;  %285 = vrot.lane.b32.xlu0 %v2327_v21, %s2202_s11  ;;  %v2342_v24 = vcombine.low %v2334_v22, %v268_v23  ;;  %v2347_v25 = vcombine.high %v2334_v22, %v268_v23  ;;  %v278_v46 = vrot.slane %v2324_v20, 4  ;;  %v277_v50 = vrot.slane %v2327_v21, 4 }
  0x24   : > { %v279_v57 = vrot.slane %v2342_v24, 4  ;;  %v280_v61 = vrot.slane %v2347_v25, 4 }
  0x26   : > { %319 = vrot.lane.b32.xlu1 %v2324_v20, %s2203_s12  ;;  %287 = vrot.lane.b32.xlu0 %v2324_v20, %s2202_s11 }
  0x2a   : > { %301 = vrot.lane.b32.xlu0 %v2327_v21, %s2201_s10  ;;  %289 = vrot.lane.b32.xlu1 %v2342_v24, %s2202_s11 }
  0x2e   : > { %317 = vrot.lane.b32.xlu0 %v2327_v21, %s2203_s12  ;;  %291 = vrot.lane.b32.xlu1 %v2347_v25, %s2202_s11 }
  0x32   : > { %305 = vrot.lane.b32.xlu0 %v2342_v24, %s2201_s10  ;;  %307 = vrot.lane.b32.xlu1 %v2347_v25, %s2201_s10 }
  0x36   : > { %321 = vrot.lane.b32.xlu0 %v2342_v24, %s2203_s12  ;;  %323 = vrot.lane.b32.xlu1 %v2347_v25, %s2203_s12 }
  0x3a   : > { %333 = vrot.lane.b32.xlu0 %v2327_v21, %s2204_s13  ;;  %335 = vrot.lane.b32.xlu1 %v2324_v20, %s2204_s13 }
  0x3e   : > { %337 = vrot.lane.b32.xlu0 %v2342_v24, %s2204_s13  ;;  %339 = vrot.lane.b32.xlu1 %v2347_v25, %s2204_s13 }
  0x42   : > { %349 = vrot.lane.b32.xlu0 %v2327_v21, %s2205_s14  ;;  %351 = vrot.lane.b32.xlu1 %v2324_v20, %s2205_s14 }
  0x46   : > { %353 = vrot.lane.b32.xlu0 %v2342_v24, %s2205_s14  ;;  %355 = vrot.lane.b32.xlu1 %v2347_v25, %s2205_s14 }
  0x4a   : > { %365 = vrot.lane.b32.xlu0 %v2327_v21, %s2206_s15  ;;  %367 = vrot.lane.b32.xlu1 %v2324_v20, %s2206_s15 }
  0x4e   : > { %369 = vrot.lane.b32.xlu0 %v2342_v24, %s2206_s15  ;;  %371 = vrot.lane.b32.xlu1 %v2347_v25, %s2206_s15 }
  0x52   : > { %381 = vrot.lane.b32.xlu0 %v2327_v21, %s2207_s16  ;;  %383 = vrot.lane.b32.xlu1 %v2324_v20, %s2207_s16 }
  0x56   : > { %385 = vrot.lane.b32.xlu0 %v2342_v24, %s2207_s16  ;;  %387 = vrot.lane.b32.xlu1 %v2347_v25, %s2207_s16 }
  0x5a   : > { %1041 = vperm.xlu0 %2088, %v999_v26   ;;  %1045 = vperm.xlu1 %2089, %v1000_v27  }
  0x5e   : > { %1101 = vperm.xlu0 %2088, %v1002_v28   ;;  %1097 = vperm.xlu1 %2089, %v1001_v29  }
  0x94   : > { %v304_v30 = vpop.permute.xlu1 %303  ;;  %v286_v31 = vpop.permute.xlu0 %285 }
  0x95   : > { %v310_v47 = vrot.slane %v304_v30, 4  ;;  %v293_v54 = vrot.slane %v286_v31, 4  ;;  %v521_v58 = vcombine.low %v2324_v20, %v304_v30 }
  0x97   : > { %v569_v62 = vcombine.low %v278_v46, %v310_v47  ;;  %v528_v24 = vrot.slane %v521_v58, %v2309_v10 }
  0x98   : > { %v320_v32 = vpop.permute.xlu1 %319  ;;  %v288_v33 = vpop.permute.xlu0 %287 }
  0x99   : > { %v326_v44 = vrot.slane %v320_v32, 4  ;;  %v294_v45 = vrot.slane %v288_v33, 4  ;;  %v529_v48 = vcombine.low %v288_v33, %v320_v32  ;;  %v576_v26 = vrot.slane %v569_v62, %v2309_v10 }
  0x9b   : > { %v577_v55 = vcombine.low %v294_v45, %v326_v44  ;;  %v536_v63 = vrot.slane %v529_v48, %v2309_v10 }
  0x9c   : > { %v302_v34 = vpop.permute.xlu0 %301  ;;  %v290_v35 = vpop.permute.xlu1 %289 }
  0x9d   : > { %v309_v56 = vrot.slane %v302_v34, 4  ;;  %v295_v59 = vrot.slane %v290_v35, 4  ;;  %v584_v14 = vrot.slane %v577_v55, %v2309_v10  ;;  %v2007_v15 = vcombine.low %v2318_v16, %v302_v34 }
  0x9f   : > { %v473_v17 = vcombine.low %v277_v50, %v309_v56  ;;  %v585_v33 = vcombine.low %v576_v26, %v584_v14  ;;  %v432_v34 = vrot.slane %v2007_v15, %v2309_v10 }
  0xa0   : > { %v318_v36 = vpop.permute.xlu0 %317  ;;  %v292_v37 = vpop.permute.xlu1 %291 }
  0xa1   : > { %v325_v49 = vrot.slane %v318_v36, 4  ;;  %v433_v1 = vcombine.low %v286_v31, %v318_v36  ;;  %v296_v18 = vrot.slane %v292_v37, 4 }
  0xa3   : > { %v481_v2 = vcombine.low %v293_v54, %v325_v49  ;;  %v440_v27 = vrot.slane %v433_v1, %v2309_v10 }
  0xa4   : > { %v306_v38 = vpop.permute.xlu0 %305  ;;  %v308_v39 = vpop.permute.xlu1 %307 }
  0xa5   : > { %v311_v60 = vrot.slane %v306_v38, 4  ;;  %v2008_v19 = vcombine.low %v2334_v22, %v306_v38  ;;  %v312_v21 = vrot.slane %v308_v39, 4  ;;  %v713_v23 = vcombine.low %v2347_v25, %v308_v39 }
  0xa6   : > { %v488_v28 = vrot.slane %v481_v2, %v2309_v10  ;;  %v537_v25 = vcombine.low %v528_v24, %v536_v63 }
  0xa7   : > { %v665_v20 = vcombine.low %v279_v57, %v311_v60  ;;  %v624_v36 = vrot.slane %v2008_v19, %v2309_v10  ;;  %v720_v38 = vrot.slane %v713_v23, %v2309_v10  ;;  %v761_v39 = vcombine.low %v280_v61, %v312_v21 }
  0xa8   : > { %v322_v40 = vpop.permute.xlu0 %321  ;;  %v324_v41 = vpop.permute.xlu1 %323  ;;  %v2447_v50 = vrot.slane %v537_v25, %v2312_v11 }
  0xa9   : > { %v327_v51 = vrot.slane %v322_v40, 4  ;;  %v625_v3 = vcombine.low %v290_v35, %v322_v40  ;;  %v328_v8 = vrot.slane %v324_v41, 4  ;;  %v721_v9 = vcombine.low %v292_v37, %v324_v41 }
  0xaa   : > { %v480_v35 = vrot.slane %v473_v17, %v2309_v10  ;;  %v672_v37 = vrot.slane %v665_v20, %v2309_v10  ;;  %v441_v40 = vcombine.low %v432_v34, %v440_v27  ;;  %v768_v54 = vrot.slane %v761_v39, %v2309_v10 }
  0xab   : > { %v673_v4 = vcombine.low %v295_v59, %v327_v51  ;;  %v632_v29 = vrot.slane %v625_v3, %v2309_v10  ;;  %v728_v30 = vrot.slane %v721_v9, %v2309_v10  ;;  %v769_v31 = vcombine.low %v296_v18, %v328_v8 }
  0xac   : > { %v2407_v42 = vpop.permute.xlu0 %333  ;;  %v2409_v43 = vpop.permute.xlu1 %335  ;;  %v489_v41 = vcombine.low %v480_v35, %v488_v28  ;;  %v2450_v51 = vrot.slane %v585_v33, %v2312_v11  ;;  %v2454_v57 = vrot.slane %v441_v40, %v2312_v11 }
  0xad   : > { %v680_v16 = vrot.slane %v673_v4, %v2309_v10  ;;  %v633_v44 = vcombine.low %v624_v36, %v632_v29  ;;  %v729_v46 = vcombine.low %v720_v38, %v728_v30  ;;  %v776_v47 = vrot.slane %v769_v31, %v2309_v10 }
  0xae   : > { %v2457_v58 = vrot.slane %v489_v41, %v2312_v11  ;;  %v341_v59 = vrot.slane %v2407_v42, 4  ;;  %v342_v60 = vrot.slane %v2409_v43, 4 }
  0xaf   : > { %v681_v45 = vcombine.low %v672_v37, %v680_v16  ;;  %v2462_v61 = vrot.slane %v633_v44, %v2312_v11  ;;  %v2468_v63 = vrot.slane %v729_v46, %v2312_v11  ;;  %v2470_v1 = vcombine.low %v768_v54, %v776_v47 }
  0xb0   : > { %v2413_v52 = vpop.permute.xlu0 %337  ;;  %v2415_v53 = vpop.permute.xlu1 %339 }
  0xb1   : > { %v2465_v62 = vrot.slane %v681_v45, %v2312_v11  ;;  %v343_v4 = vrot.slane %v2413_v52, 4  ;;  %v344_v8 = vrot.slane %v2415_v53, 4 }
  0xb4   : > { %v2421_v12 = vpop.permute.xlu0 %349  ;;  %v2423_v13 = vpop.permute.xlu1 %351 }
  0xb5   : > { %v357_v20 = vrot.slane %v2421_v12, 4  ;;  %v358_v21 = vrot.slane %v2423_v13, 4 }
  0xb8   : > { %v2436_v22 = vpop.permute.xlu0 %353  ;;  %v2438_v32 = vpop.permute.xlu1 %355 }
  0xb9   : > { %v359_v23 = vrot.slane %v2436_v22, 4  ;;  %v360_v26 = vrot.slane %v2438_v32, 4 }
  0xbc   : > { %v366_v48 = vpop.permute.xlu0 %365  ;;  %v368_v49 = vpop.permute.xlu1 %367 }
  0xbd   : > { %v373_v55 = vrot.slane %v366_v48, 4  ;;  %v374_v56 = vrot.slane %v368_v49, 4  ;;  %v449_v9 = vcombine.low %v2407_v42, %v366_v48  ;;  %v545_v17 = vcombine.low %v2409_v43, %v368_v49 }
  0xbf   : > { %v497_v15 = vcombine.low %v341_v59, %v373_v55  ;;  %v593_v18 = vcombine.low %v342_v60, %v374_v56  ;;  %v456_v43 = vrot.slane %v449_v9, %v2309_v10  ;;  %v552_v34 = vrot.slane %v545_v17, %v2309_v10 }
  0xc0   : > { %v370_v2 = vpop.permute.xlu0 %369  ;;  %v372_v3 = vpop.permute.xlu1 %371 }
  0xc1   : > { %v375_v14 = vrot.slane %v370_v2, 4  ;;  %v376_v19 = vrot.slane %v372_v3, 4  ;;  %v641_v24 = vcombine.low %v2413_v52, %v370_v2  ;;  %v737_v28 = vcombine.low %v2415_v53, %v372_v3 }
  0xc2   : > { %v504_v33 = vrot.slane %v497_v15, %v2309_v10  ;;  %v600_v52 = vrot.slane %v593_v18, %v2309_v10 }
  0xc3   : > { %v689_v27 = vcombine.low %v343_v4, %v375_v14  ;;  %v785_v42 = vcombine.low %v344_v8, %v376_v19  ;;  %v648_v53 = vrot.slane %v641_v24, %v2309_v10  ;;  %v744_v40 = vrot.slane %v737_v28, %v2309_v10 }
  0xc4   : > { %v382_v29 = vpop.permute.xlu0 %381  ;;  %v384_v16 = vpop.permute.xlu1 %383 }
  0xc5   : > { %v389_v30 = vrot.slane %v382_v29, 4  ;;  %v457_v31 = vcombine.low %v2421_v12, %v382_v29  ;;  %v390_v25 = vrot.slane %v384_v16, 4  ;;  %v553_v35 = vcombine.low %v2423_v13, %v384_v16 }
  0xc6   : > { %v696_v39 = vrot.slane %v689_v27, %v2309_v10  ;;  %v792_v12 = vrot.slane %v785_v42, %v2309_v10 }
  0xc7   : > { %v464_v36 = vrot.slane %v457_v31, %v2309_v10  ;;  %v505_v37 = vcombine.low %v357_v20, %v389_v30  ;;  %v601_v38 = vcombine.low %v358_v21, %v390_v25  ;;  %v560_v41 = vrot.slane %v553_v35, %v2309_v10 }
  0xc8   : > { %v386_v44 = vpop.permute.xlu0 %385  ;;  %v388_v45 = vpop.permute.xlu1 %387 }
  0xc9   : > { %v465_v46 = vcombine.low %v456_v43, %v464_v36  ;;  %v512_v47 = vrot.slane %v505_v37, %v2309_v10  ;;  %v608_v13 = vrot.slane %v601_v38, %v2309_v10  ;;  %v391_v48 = vrot.slane %v386_v44, 4 }
  0xca   : > { %v561_v49 = vcombine.low %v552_v34, %v560_v41  ;;  %v649_v54 = vcombine.low %v2436_v22, %v386_v44  ;;  %v392_v55 = vrot.slane %v388_v45, 4  ;;  %v745_v56 = vcombine.low %v2438_v32, %v388_v45 }
  0xcb   : > { %v2499_v59 = vrot.slane %v465_v46, %v2312_v11  ;;  %v513_v60 = vcombine.low %v504_v33, %v512_v47  ;;  %v609_v2 = vcombine.low %v600_v52, %v608_v13  ;;  %v697_v3 = vcombine.low %v359_v23, %v391_v48 }
  0xcc   : > { %v2502_v4 = vrot.slane %v561_v49, %v2312_v11  ;;  %v656_v8 = vrot.slane %v649_v54, %v2309_v10  ;;  %v752_v9 = vrot.slane %v745_v56, %v2309_v10  ;;  %v793_v14 = vcombine.low %v360_v26, %v392_v55 }
  0xcd   : > { %v2507_v15 = vrot.slane %v513_v60, %v2312_v11  ;;  %v825_v22 = vcombine.low %v2454_v57, %v2499_v59  ;;  %v2512_v32 = vrot.slane %v609_v2, %v2312_v11  ;;  %v704_v17 = vrot.slane %v697_v3, %v2309_v10 }
  0xce   : > { %v827_v18 = vcombine.low %v2447_v50, %v2502_v4  ;;  %v657_v19 = vcombine.low %v648_v53, %v656_v8  ;;  %v753_v20 = vcombine.low %v744_v40, %v752_v9  ;;  %v800_v21 = vrot.slane %v793_v14, %v2309_v10 }
  0xcf   : > { %v2520_v23 = vrot.slane %v2470_v1, %v2312_v11  ;;  %v826_v24 = vcombine.low %v2457_v58, %v2507_v15  ;;  %v828_v26 = vcombine.low %v2450_v51, %v2512_v32  ;;  %v705_v27 = vcombine.low %v696_v39, %v704_v17 }
  0xd0   : > { %v842_v28 = vsel %vm841_vm0, %v825_v22, 0.0  ;;  %v2528_v42 = vrot.slane %v657_v19, %v2312_v11  ;;  %v2531_v29 = vrot.slane %v753_v20, %v2312_v11  ;;  %v801_v16 = vcombine.low %v792_v12, %v800_v21 }
  0xd1   : > { %v843_v43 = vsel %vm841_vm0, %v826_v24, 0.0  ;;  %v851_v1 = vsel %vm841_vm0, %v827_v18, 0.0  ;;  %v852_v30 = vsel %vm841_vm0, %v828_v26, 0.0  ;;  %v2537_v31 = vrot.slane %v705_v27, %v2312_v11 }
  0xd2   : > { %v844_v25 = vadd.f32 %v843_v43, %v842_v28  ;;  %v853_v33 = vadd.f32 %v852_v30, %v851_v1  ;;  %v829_v34 = vcombine.low %v2462_v61, %v2528_v42  ;;  %v2542_v52 = vrot.slane %v801_v16, %v2312_v11 }
  0xd3   : > { %v830_v35 = vcombine.low %v2465_v62, %v2537_v31  ;;  %v831_v53 = vcombine.low %v2468_v63, %v2531_v29 }
  0xd4   : > { %v845_v36 = vrot.slane %v844_v25, 4  ;;  %v854_v37 = vrot.slane %v853_v33, 4  ;;  %v832_v38 = vcombine.low %v2520_v23, %v2542_v52  ;;  %v860_v39 = vsel %vm841_vm0, %v829_v34, 0.0 }
  0xd5   : > { %v861_v40 = vsel %vm841_vm0, %v830_v35, 0.0  ;;  %v869_v12 = vsel %vm841_vm0, %v831_v53, 0.0 }
  0xd6   : > { %v846_v41 = vadd.f32 %v845_v36, %v844_v25  ;;  %v855_v44 = vadd.f32 %v854_v37, %v853_v33  ;;  %v862_v45 = vadd.f32 %v861_v40, %v860_v39  ;;  %v870_v46 = vsel %vm841_vm0, %v832_v38, 0.0 }
  0xd7   : > { %v871_v47 = vadd.f32 %v870_v46, %v869_v12 }
  0xd8   : > { %v847_v13 = vrot.slane %v846_v41, 2  ;;  %v856_v48 = vrot.slane %v855_v44, 2  ;;  %v863_v49 = vrot.slane %v862_v45, 4 }
  0xd9   : > { %v872_v54 = vrot.slane %v871_v47, 4 }
  0xda   : > { %v848_v55 = vadd.f32 %v847_v13, %v846_v41  ;;  %v857_v56 = vadd.f32 %v856_v48, %v855_v44  ;;  %v864_v60 = vadd.f32 %v863_v49, %v862_v45 }
  0xdb   : > { %v873_v2 = vadd.f32 %v872_v54, %v871_v47 }
  0xdc   : > { %v849_v3 = vrot.slane %v848_v55, 1  ;;  %v858_v8 = vrot.slane %v857_v56, 1  ;;  %v865_v9 = vrot.slane %v864_v60, 2 }
  0xdd   : > { %v874_v14 = vrot.slane %v873_v2, 2 }
  0xde   : > { %v850_v22 = vadd.f32 %v849_v3, %v848_v55  ;;  %v859_v17 = vadd.f32 %v858_v8, %v857_v56  ;;  %v866_v18 = vadd.f32 %v865_v9, %v864_v60 }
  0xdf   : > { %v875_v19 = vadd.f32 %v874_v14, %v873_v2 }
  0xe0   : > { %v879_v20 = vmul.f32 0.0625, %v850_v22  ;;  %v880_v21 = vmul.f32 0.0625, %v859_v17  ;;  %v867_v24 = vrot.slane %v866_v18, 1 }
  0xe1   : > { %v876_v26 = vrot.slane %v875_v19, 1 }
  0xe2   : > { %v887_v27 = vcombine.high %v879_v20, %v879_v20  ;;  %v2555_v28 = vsub.f32 %v2454_v57, %v879_v20  ;;  %v2558_v16 = vsub.f32 %v2457_v58, %v879_v20  ;;  %v888_v43 = vcombine.high %v880_v21, %v880_v21 }
  0xe3   : > { %v2561_v1 = vsub.f32 %v2447_v50, %v880_v21  ;;  %v2564_v30 = vsub.f32 %v2450_v51, %v880_v21  ;;  %v868_v25 = vadd.f32 %v867_v24, %v866_v18  ;;  %v877_v33 = vadd.f32 %v876_v26, %v875_v19 }
  0xe4   : > { %v2567_v34 = vsub.f32 %v2499_v59, %v887_v27  ;;  %v2570_v35 = vsub.f32 %v2507_v15, %v887_v27  ;;  %v911_v57 = vmul.f32 %v2555_v28, %v2555_v28  ;;  %v913_v58 = vmul.f32 %v2558_v16, %v2558_v16 }
  0xe5   : > { %v2577_v50 = vsub.f32 %v2502_v4, %v888_v43  ;;  %v2580_v51 = vsub.f32 %v2512_v32, %v888_v43  ;;  %v881_v15 = vmul.f32 0.0625, %v868_v25  ;;  %v882_v36 = vmul.f32 0.0625, %v877_v33 }
  0xe6   : > { %v912_v53 = vmul.f32 %v2567_v34, %v2567_v34  ;;  %v914_v59 = vmul.f32 %v2570_v35, %v2570_v35  ;;  %v915_v37 = vmul.f32 %v2561_v1, %v2561_v1  ;;  %v917_v4 = vmul.f32 %v2564_v30, %v2564_v30 }
  0xe7   : > { %v916_v38 = vmul.f32 %v2577_v50, %v2577_v50  ;;  %v918_v32 = vmul.f32 %v2580_v51, %v2580_v51  ;;  %v889_v12 = vcombine.high %v881_v15, %v881_v15  ;;  %v2595_v41 = vsub.f32 %v2462_v61, %v881_v15 }
  0xe8   : > { %v943_v39 = vcombine.low %v911_v57, %v912_v53  ;;  %v944_v40 = vcombine.low %v913_v58, %v914_v59  ;;  %v2598_v46 = vsub.f32 %v2465_v62, %v881_v15  ;;  %v890_v47 = vcombine.high %v882_v36, %v882_v36 }
  0xe9   : > { %v945_v44 = vcombine.low %v915_v37, %v916_v38  ;;  %v946_v45 = vcombine.low %v917_v4, %v918_v32  ;;  %v2603_v49 = vsub.f32 %v2528_v42, %v889_v12  ;;  %v2606_v54 = vsub.f32 %v2537_v31, %v889_v12 }
  0xea   : > { %v959_v13 = vsel %vm841_vm0, %v943_v39, 0.0  ;;  %v960_v48 = vsel %vm841_vm0, %v944_v40, 0.0  ;;  %v919_v62 = vmul.f32 %v2595_v41, %v2595_v41  ;;  %v921_v3 = vmul.f32 %v2598_v46, %v2598_v46 }
  0xeb   : > { %v961_v55 = vadd.f32 %v960_v48, %v959_v13  ;;  %v968_v61 = vsel %vm841_vm0, %v945_v44, 0.0  ;;  %v969_v56 = vsel %vm841_vm0, %v946_v45, 0.0  ;;  %v920_v2 = vmul.f32 %v2603_v49, %v2603_v49 }
  0xec   : > { %v970_v60 = vadd.f32 %v969_v56, %v968_v61  ;;  %v922_v42 = vmul.f32 %v2606_v54, %v2606_v54  ;;  %v2619_v8 = vsub.f32 %v2468_v63, %v882_v36  ;;  %v2622_v9 = vsub.f32 %v2531_v29, %v890_v47 }
  0xed   : > { %v962_v31 = vrot.slane %v961_v55, 4  ;;  %v2625_v14 = vsub.f32 %v2520_v23, %v882_v36  ;;  %v947_v17 = vcombine.low %v919_v62, %v920_v2  ;;  %v2628_v19 = vsub.f32 %v2542_v52, %v890_v47 }
  0xee   : > { %v971_v22 = vrot.slane %v970_v60, 4  ;;  %v948_v18 = vcombine.low %v921_v3, %v922_v42  ;;  %v923_v21 = vmul.f32 %v2619_v8, %v2619_v8  ;;  %v924_v63 = vmul.f32 %v2622_v9, %v2622_v9 }
  0xef   : > { %v963_v20 = vadd.f32 %v962_v31, %v961_v55  ;;  %v925_v29 = vmul.f32 %v2625_v14, %v2625_v14  ;;  %v977_v23 = vsel %vm841_vm0, %v947_v17, 0.0  ;;  %v926_v27 = vmul.f32 %v2628_v19, %v2628_v19 }
  0xf0   : > { %v972_v24 = vadd.f32 %v971_v22, %v970_v60  ;;  %v978_v26 = vsel %vm841_vm0, %v948_v18, 0.0  ;;  %v949_v25 = vcombine.low %v923_v21, %v924_v63  ;;  %v2208_v62 = vmov 839922192  }
  0xf1   : > { %v964_v52 = vrot.slane %v963_v20, 2  ;;  %v979_v43 = vadd.f32 %v978_v26, %v977_v23  ;;  %v950_v57 = vcombine.low %v925_v29, %v926_v27  ;;  %v1048_v60 = vunpack.c.l.s4 %v2208_v62  ;;  %v1046_v27 = vpop.permute.xlu1 %1045 }
  0xf2   : > { %v973_v33 = vrot.slane %v972_v24, 2  ;;  %v986_v59 = vsel %vm841_vm0, %v949_v25, 0.0  ;;  %v2209_v31 = vmov 1985246804  }
  0xf3   : > { %v965_v58 = vadd.f32 %v964_v52, %v963_v20  ;;  %v980_v53 = vrot.slane %v979_v43, 4  ;;  %v987_v36 = vsel %vm841_vm0, %v950_v57, 0.0  ;;  %v1055_v22 = vunpack.c.l.s4 %v2209_v31 }
  0xf4   : > { %v974_v15 = vadd.f32 %v973_v33, %v972_v24  ;;  %v988_v4 = vadd.f32 %v987_v36, %v986_v59  ;;  %v1049_v20 = vunpack.c.0.s8 %v1048_v60  ;;  %v1042_v24 = vpop.permute.xlu0 %1041 }
  0xf5   : > { %v966_v37 = vrot.slane %v965_v58, 1  ;;  %v981_v38 = vadd.f32 %v980_v53, %v979_v43  ;;  %v1056_v29 = vunpack.c.0.s8 %v1055_v22 }
  0xf6   : > { %v975_v32 = vrot.slane %v974_v15, 1  ;;  %v989_v12 = vrot.slane %v988_v4, 4  ;;  %v1052_v26 = vsub.s32 %v1049_v20, %v2301_v6 }
  0xf7   : > { %v967_v39 = vadd.f32 %v966_v37, %v965_v58  ;;  %v982_v40 = vrot.slane %v981_v38, 2  ;;  %v1059_v43 = vsub.s32 %v1056_v29, %v2301_v6 }
  0xf8   : > { %v976_v44 = vadd.f32 %v975_v32, %v974_v15  ;;  %v990_v13 = vadd.f32 %v989_v12, %v988_v4  ;;  %v1067_v33 = vrot.slane %v1046_v27, %v1052_v26  ;;  %v1053_v53 = vrot.slane %v1042_v24, %v1052_v26  ;;  %v1102_v15 = vpop.permute.xlu0 %1101  ;;  %v1098_v32 = vpop.permute.xlu1 %1097 }
  0xf9   : > { %v995_v45 = vmul.f32 0.0625, %v967_v39  ;;  %v983_v47 = vadd.f32 %v982_v40, %v981_v38  ;;  %v1074_v4 = vrot.slane %v1046_v27, %v1059_v43  ;;  %v1060_v39 = vrot.slane %v1042_v24, %v1059_v43 }
  0xfa   : > { %v996_v48 = vmul.f32 0.0625, %v976_v44  ;;  %v991_v56 = vrot.slane %v990_v13, 2  ;;  %v1116_v60 = vrot.slane %v1098_v32, %v1059_v43 }
  0xfb   : > { %v1003_v55 = vadd.f32 1e-05, %v995_v45  ;;  %v984_v61 = vrot.slane %v983_v47, 1 }
  0xfc   : > { %v1004_v2 = vadd.f32 1e-05, %v996_v48  ;;  %v992_v42 = vadd.f32 %v991_v56, %v990_v13  ;;  %v1130_v13 = vrot.slane %v1102_v15, %v1059_v43  ;;  %v1109_v48 = vrot.slane %v1098_v32, %v1052_v26 }
  0xfd   : > { %2125 = vrsqrt.f32 %v1003_v55  ;;  %v985_v3 = vadd.f32 %v984_v61, %v983_v47  ;;  %v1123_v47 = vrot.slane %v1102_v15, %v1052_v26 }
  0xfe   : > { %2127 = vrsqrt.f32 %v1004_v2  ;;  %v993_v18 = vrot.slane %v992_v42, 1 }
  0xff   : > { %v997_v17 = vmul.f32 0.0625, %v985_v3 }
 0x100   : > { %v994_v63 = vadd.f32 %v993_v18, %v992_v42 }
 0x101   : > { %v1005_v21 = vadd.f32 1e-05, %v997_v17 }
 0x102   : > { %v998_v23 = vmul.f32 0.0625, %v994_v63 }
 0x103   : > { %2129 = vrsqrt.f32 %v1005_v21 }
 0x104   : > { %v1006_v52 = vadd.f32 1e-05, %v998_v23 }
 0x106   : > { %2131 = vrsqrt.f32 %v1006_v52 }
 0x107   : > { %v2126_v25 = vpop.eup %2125 }
 0x108   : > { %v2128_v57 = vpop.eup %2127  ;;  %v1015_v58 = vcombine.high %v2126_v25, %v2126_v25  ;;  %v1025_v59 = vmul.f32 %v2126_v25, %v2558_v16  ;;  %v1023_v36 = vmul.f32 %v2126_v25, %v2555_v28 }
 0x109   : > { %v1027_v37 = vmul.f32 %v2128_v57, %v2561_v1  ;;  %v1029_v38 = vmul.f32 %v2128_v57, %v2564_v30  ;;  %v1016_v44 = vcombine.high %v2128_v57, %v2128_v57 }
 0x10a   : > { %v1026_v40 = vmul.f32 %v1015_v58, %v2570_v35  ;;  %v1024_v12 = vmul.f32 %v1015_v58, %v2567_v34  ;;  %v1081_v45 = vmul.f32 %v1067_v33, %v1025_v59  ;;  %v1079_v55 = vmul.f32 %v1053_v53, %v1023_v36 }
 0x10b   : > { %v1083_v61 = vmul.f32 %v1053_v53, %v1027_v37  ;;  %v1085_v56 = vmul.f32 %v1067_v33, %v1029_v38  ;;  %v1028_v35 = vmul.f32 %v1016_v44, %v2577_v50  ;;  %v1030_v34 = vmul.f32 %v1016_v44, %v2580_v51 }
 0x10c   : > { %v1082_v28 = vmul.f32 %v1074_v4, %v1026_v40  ;;  %v1080_v2 = vmul.f32 %v1060_v39, %v1024_v12  ;;  %v1137_v3 = vadd.f32 %v1123_v47, %v1081_v45  ;;  %v1135_v63 = vadd.f32 %v1109_v48, %v1079_v55 }
 0x10d   : > { %v2130_v16 = vpop.eup %2129  ;;  %v1141_v21 = vadd.f32 %v1123_v47, %v1085_v56  ;;  %v1084_v38 = vmul.f32 %v1060_v39, %v1028_v35 }
 0x10e   : > { %v1017_v1 = vcombine.high %v2130_v16, %v2130_v16  ;;  %v1031_v30 = vmul.f32 %v2130_v16, %v2595_v41  ;;  %v1033_v62 = vmul.f32 %v2130_v16, %v2598_v46  ;;  %v1138_v20 = vadd.f32 %v1130_v13, %v1082_v28 }
 0x10f   : > { %v1139_v41 = vadd.f32 %v1109_v48, %v1083_v61  ;;  %v1136_v26 = vadd.f32 %v1116_v60, %v1080_v2  ;;  %v1140_v61 = vadd.f32 %v1116_v60, %v1084_v38 }
 0x110   : > { %v1032_v42 = vmul.f32 %v1017_v1, %v2603_v49  ;;  %v1087_v31 = vmul.f32 %v1053_v53, %v1031_v30  ;;  %v1034_v22 = vmul.f32 %v1017_v1, %v2606_v54  ;;  %v1089_v17 = vmul.f32 %v1067_v33, %v1033_v62  ;;  %v2132_v18 = vpop.eup %2131 }
 0x111   : > { %v1018_v29 = vcombine.high %v2132_v18, %v2132_v18  ;;  %v1035_v46 = vmul.f32 %v2132_v18, %v2619_v8  ;;  %v1037_v50 = vmul.f32 %v2132_v18, %v2625_v14  ;;  %v1086_v14 = vmul.f32 %v1074_v4, %v1030_v34 }
 0x112   : > { %v1088_v24 = vmul.f32 %v1060_v39, %v1032_v42  ;;  %v1090_v23 = vmul.f32 %v1074_v4, %v1034_v22  ;;  %v1145_v51 = vadd.f32 %v1123_v47, %v1089_v17  ;;  %v1143_v27 = vadd.f32 %v1109_v48, %v1087_v31 }
 0x113   : > { %v1036_v49 = vmul.f32 %v1018_v29, %v2622_v9  ;;  %v1091_v52 = vmul.f32 %v1053_v53, %v1035_v46  ;;  %v1038_v54 = vmul.f32 %v1018_v29, %v2628_v19  ;;  %v1093_v43 = vmul.f32 %v1067_v33, %v1037_v50 }
 0x114   : > { %v1146_v25 = vadd.f32 %v1130_v13, %v1090_v23  ;;  %v1144_v57 = vadd.f32 %v1116_v60, %v1088_v24  ;;  %v1219_v58 = vcombine.low %v1137_v3, %v1145_v51  ;;  %v1151_v59 = vcombine.low %v1135_v63, %v1143_v27 }
 0x115   : > { %v1092_v15 = vmul.f32 %v1060_v39, %v1036_v49  ;;  %v1094_v36 = vmul.f32 %v1074_v4, %v1038_v54  ;;  %v1149_v8 = vadd.f32 %v1123_v47, %v1093_v43  ;;  %v1147_v37 = vadd.f32 %v1109_v48, %v1091_v52 }
 0x116   : > { %v1253_v32 = vcombine.low %v1138_v20, %v1146_v25  ;;  %v1185_v40 = vcombine.low %v1136_v26, %v1144_v57  ;;  %v1226_v12 = vrot.slane %v1219_v58, %v2309_v10  ;;  %v1158_v9 = vrot.slane %v1151_v59, %v2309_v10 }
 0x117   : > { %v1227_v44 = vcombine.low %v1141_v21, %v1149_v8  ;;  %v1159_v53 = vcombine.low %v1139_v41, %v1147_v37  ;;  %v1150_v19 = vadd.f32 %v1130_v13, %v1094_v36  ;;  %v1148_v33 = vadd.f32 %v1116_v60, %v1092_v15 }
 0x118   : > { %v1142_v55 = vadd.f32 %v1130_v13, %v1086_v14  ;;  %v1260_v13 = vrot.slane %v1253_v32, %v2309_v10  ;;  %v1192_v60 = vrot.slane %v1185_v40, %v2309_v10  ;;  %v1367_v29 = vadd.s32 8, %v2301_v6 }
 0x119   : > { %v1234_v45 = vrot.slane %v1227_v44, %v2309_v10  ;;  %v1166_v16 = vrot.slane %v1159_v53, %v2309_v10  ;;  %v1193_v56 = vcombine.low %v1140_v61, %v1148_v33  ;;  %v2694_v46 = vand.u32 127, %v228_v0 }
 0x11a   : > { %v1261_v28 = vcombine.low %v1142_v55, %v1150_v19  ;;  %v1424_v23 = vrot.slane %v1367_v29, %v2309_v10  ;;  %v1375_v0 = vrot.slane %v2301_v6, %v2309_v10  ;;  %v1417_v14 = vcombine.high %v1367_v29, %v2200_v7 }
 0x11b   : > { %v1236_v47 = vcombine.high %v1226_v12, %v1234_v45  ;;  %v1168_v48 = vcombine.high %v1158_v9, %v1166_v16  ;;  %v1235_v39 = vcombine.low %v1226_v12, %v1234_v45  ;;  %v1167_v4 = vcombine.low %v1158_v9, %v1166_v16 }
 0x11c   : > { %v1268_v3 = vrot.slane %v1261_v28, %v2309_v10  ;;  %v1200_v42 = vrot.slane %v1193_v56, %v2309_v10  ;;  %v1517_v51 = vrot.slane %v2694_v46, %v2309_v10  ;;  %v2710_v49 = vrot.slane %v1424_v23, %v2312_v11 }
 0x11d   : > { %v1250_v1 = vrot.slane %v1236_v47, %v2312_v11  ;;  %v1182_v30 = vrot.slane %v1168_v48, %v2312_v11  ;;  %v2667_v62 = vrot.slane %v1235_v39, %v2312_v11  ;;  %v2670_v35 = vrot.slane %v1167_v4, %v2312_v11 }
 0x11e   : > { %v1269_v17 = vcombine.low %v1260_v13, %v1268_v3  ;;  %v1201_v18 = vcombine.low %v1192_v60, %v1200_v42  ;;  %v1270_v63 = vcombine.high %v1260_v13, %v1268_v3  ;;  %v1202_v41 = vcombine.high %v1192_v60, %v1200_v42 }
 0x11f   : > { %1320 = vrot.lane.b32.xlu0 %v1250_v1, %s2206_s15  ;;  %1292 = vrot.lane.b32.xlu1 %v1182_v30, %s2206_s15  ;;  %v1251_v2 = vcombine.high %v2667_v62, %v2199_v5  ;;  %v1183_v34 = vcombine.high %v2670_v35, %v2199_v5  ;;  %v1252_v31 = vcombine.high %v1250_v1, %v2199_v5 }
 0x120   : > { %v1184_v22 = vcombine.high %v1182_v30, %v2199_v5  ;;  %v1277_v20 = vrot.slane %v1269_v17, %v2312_v11  ;;  %v1209_v21 = vrot.slane %v1201_v18, %v2312_v11  ;;  %v1284_v24 = vrot.slane %v1270_v63, %v2312_v11 }
 0x121   : > { %v1216_v50 = vrot.slane %v1202_v41, %v2312_v11  ;;  %v2713_v52 = vrot.slane %v1517_v51, %v2312_v11  ;;  %v2718_v25 = vrot.slane %v1375_v0, %v2312_v11  ;;  %v1462_v57 = vcombine.high %v2710_v49, %v2200_v7 }
 0x122   : > { %v1285_v26 = vcombine.high %v1277_v20, %v2199_v5  ;;  %v1217_v27 = vcombine.high %v1209_v21, %v2199_v5  ;;  %v1286_v54 = vcombine.high %v1284_v24, %v2199_v5  ;;  %v1432_v59 = vcombine.high %v1424_v23, %v2200_v7 }
 0x123   : > { %1316 = vrot.lane.b32.xlu0 %v1251_v2, %s2207_s16  ;;  %1288 = vrot.lane.b32.xlu1 %v1183_v34, %s2207_s16  ;;  %v1218_v43 = vcombine.high %v1216_v50, %v2199_v5  ;;  %v1555_v58 = vcombine.high %v2713_v52, %v2200_v7  ;;  %v1413_v15 = vcombine.high %v2718_v25, %v2200_v7 }
 0x124   : > { %v1446_v5 = vrot.slane %v1432_v59, %v2312_v11  ;;  %v1525_v36 = vcombine.high %v1517_v51, %v2200_v7  ;;  %v1383_v8 = vcombine.high %v1375_v0, %v2200_v7  ;;  %v1431_v12 = vrot.slane %v1417_v14, %v2309_v10 }
 0x125   : > { %v1510_v44 = vcombine.high %v2694_v46, %v2200_v7  ;;  %v1368_v9 = vcombine.high %v2301_v6, %v2200_v7 }
 0x126   : > { %v1539_v37 = vrot.slane %v1525_v36, %v2312_v11  ;;  %v1397_v38 = vrot.slane %v1383_v8, %v2312_v11  ;;  %v1463_v32 = vcombine.high %v1446_v5, %v2200_v7  ;;  %v1454_v19 = vrot.slane %v1431_v12, %v2312_v11 }
 0x127   : > { %1324 = vrot.lane.b32.xlu0 %v1252_v31, %s2205_s14  ;;  %1296 = vrot.lane.b32.xlu1 %v1184_v22, %s2205_s14  ;;  %v1524_v33 = vrot.slane %v1510_v44, %v2309_v10  ;;  %v1382_v45 = vrot.slane %v1368_v9, %v2309_v10  ;;  %v1447_v48 = vcombine.high %v1431_v12, %v2200_v7 }
 0x128   : > { %v1556_v40 = vcombine.high %v1539_v37, %v2200_v7  ;;  %v1414_v53 = vcombine.high %v1397_v38, %v2200_v7  ;;  %v1464_v61 = vcombine.high %v1454_v19, %v2200_v7 }
 0x129   : > { %v1547_v16 = vrot.slane %v1524_v33, %v2312_v11  ;;  %v1405_v55 = vrot.slane %v1382_v45, %v2312_v11  ;;  %v1540_v10 = vcombine.high %v1524_v33, %v2200_v7  ;;  %v1461_v4 = vrot.slane %v1447_v48, %v2312_v11 }
 0x12a   : > { %v1398_v28 = vcombine.high %v1382_v45, %v2200_v7 }
 0x12b   : > { %1328 = vrot.lane.b32.xlu0 %v1277_v20, %s2204_s13  ;;  %1300 = vrot.lane.b32.xlu1 %v1209_v21, %s2204_s13  ;;  %v1557_v47 = vcombine.high %v1547_v16, %v2200_v7  ;;  %v1415_v39 = vcombine.high %v1405_v55, %v2200_v7  ;;  %v1554_v56 = vrot.slane %v1540_v10, %v2312_v11 }
 0x12c   : > { %v1412_v1 = vrot.slane %v1398_v28, %v2312_v11  ;;  %v1465_v30 = vcombine.high %v1461_v4, %v2200_v7 }
 0x12d   : > { %v1558_v13 = vcombine.high %v1554_v56, %v2200_v7 }
 0x12e   : > { %v1416_v60 = vcombine.high %v1412_v1, %v2200_v7 }
 0x12f   : > { %1336 = vrot.lane.b32.xlu0 %v1284_v24, %s2201_s10  ;;  %1308 = vrot.lane.b32.xlu1 %v1216_v50, %s2201_s10 }
 0x133   : > { %1332 = vrot.lane.b32.xlu0 %v1285_v26, %s2203_s12  ;;  %1304 = vrot.lane.b32.xlu1 %v1217_v27, %s2203_s12 }
 0x137   : > { %1340 = vrot.lane.b32.xlu0 %v1286_v54, %s2202_s11  ;;  %1312 = vrot.lane.b32.xlu1 %v1218_v43, %s2202_s11 }
 0x13b   : > { %1480 = vrot.lane.b32.xlu1 %v1462_v57, %s2207_s16  ;;  %1559 = vrot.lane.b32.xlu0 %v1555_v58, %s2207_s16 }
 0x13f   : > { %1466 = vrot.lane.b32.xlu1 %v1413_v15, %s2207_s16  ;;  %1482 = vrot.lane.b32.xlu0 %v1446_v5, %s2206_s15 }
 0x143   : > { %1561 = vrot.lane.b32.xlu1 %v1539_v37, %s2206_s15  ;;  %1468 = vrot.lane.b32.xlu0 %v1397_v38, %s2206_s15  ;;  %s2215_s15 = smov 113  }
 0x147   : > { %1484 = vrot.lane.b32.xlu1 %v1463_v32, %s2205_s14  ;;  %1563 = vrot.lane.b32.xlu0 %v1556_v40, %s2205_s14 }
 0x14b   : > { %1470 = vrot.lane.b32.xlu1 %v1414_v53, %s2205_s14  ;;  %1486 = vrot.lane.b32.xlu0 %v1454_v19, %s2204_s13  ;;  %s2214_s14 = smov 111  }
 0x14f   : > { %1565 = vrot.lane.b32.xlu1 %v1547_v16, %s2204_s13  ;;  %1472 = vrot.lane.b32.xlu0 %v1405_v55, %s2204_s13  ;;  %s2213_s13 = smov 127   ;;  %v1784_v55 = vld [vmem:[%s3115_s4] sm:$0xf] }
 0x153   : > { %1488 = vrot.lane.b32.xlu1 %v1464_v61, %s2203_s12  ;;  %1567 = vrot.lane.b32.xlu0 %v1557_v47, %s2203_s12 }
 0x157   : > { %1474 = vrot.lane.b32.xlu1 %v1415_v39, %s2203_s12  ;;  %1490 = vrot.lane.b32.xlu0 %v1461_v4, %s2201_s10  ;;  %s2212_s12 = smov 17  }
 0x15b   : > { %1569 = vrot.lane.b32.xlu1 %v1554_v56, %s2201_s10  ;;  %1476 = vrot.lane.b32.xlu0 %v1412_v1, %s2201_s10  ;;  %s2211_s10 = smov 15  }
 0x15f   : > { %1492 = vrot.lane.b32.xlu1 %v1465_v30, %s2202_s11  ;;  %1571 = vrot.lane.b32.xlu0 %v1558_v13, %s2202_s11 }
 0x163   : > { %1478 = vrot.lane.b32.xlu1 %v1416_v60, %s2202_s11 }
 0x191   : > { %v1321_v2 = vpop.permute.xlu0 %1320  ;;  %v1293_v34 = vpop.permute.xlu1 %1292 }
 0x195   : > { %v1317_v3 = vpop.permute.xlu0 %1316  ;;  %v1289_v11 = vpop.permute.xlu1 %1288 }
 0x196   : > { %v1356_v18 = vsel %vm841_vm0, %v2667_v62, %v1317_v3  ;;  %v1343_v20 = vsel %vm841_vm0, %v2670_v35, %v1289_v11 }
 0x197   : > { %v1357_v41 = vsel %vm1344_vm1, %v1356_v18, %v1321_v2  ;;  %v1345_v29 = vsel %vm1344_vm1, %v1343_v20, %v1293_v34 }
 0x199   : > { %v1325_v42 = vpop.permute.xlu0 %1324  ;;  %v1297_v31 = vpop.permute.xlu1 %1296 }
 0x19a   : > { %v1358_v24 = vsel %vm1346_vm2, %v1357_v41, %v1325_v42  ;;  %v1347_v50 = vsel %vm1346_vm2, %v1345_v29, %v1297_v31 }
 0x19d   : > { %v1329_v22 = vpop.permute.xlu0 %1328  ;;  %v1301_v17 = vpop.permute.xlu1 %1300 }
 0x19e   : > { %v1359_v23 = vsel %vm1348_vm3, %v1358_v24, %v1329_v22  ;;  %v1349_v62 = vsel %vm1348_vm3, %v1347_v50, %v1301_v17 }
 0x1a1   : > { %v1337_v21 = vpop.permute.xlu0 %1336  ;;  %v1309_v63 = vpop.permute.xlu1 %1308 }
 0x1a5   : > { %v1333_v51 = vpop.permute.xlu0 %1332  ;;  %v1305_v35 = vpop.permute.xlu1 %1304 }
 0x1a6   : > { %v1360_v26 = vsel %vm1350_vm4, %v1359_v23, %v1333_v51  ;;  %v1351_v27 = vsel %vm1350_vm4, %v1349_v62, %v1305_v35  ;;  %v2875_v51 = vsub.s32 0, %v2301_v6 }
 0x1a7   : > { %v1361_v0 = vsel %vm1352_vm5, %v1360_v26, %v1337_v21  ;;  %v1353_v43 = vsel %vm1352_vm5, %v1351_v27, %v1309_v63 }
 0x1a9   : > { %v1341_v54 = vpop.permute.xlu0 %1340  ;;  %v1313_v57 = vpop.permute.xlu1 %1312 }
 0x1aa   : > { %v2796_v58 = vsel %vm1354_vm6, %v1361_v0, %v1341_v54  ;;  %v2799_v59 = vsel %vm1354_vm6, %v1353_v43, %v1313_v57 }
 0x1ab   : > { %v2802_v15 = vmax.f32 %v2796_v58, 0.0  ;;  %v2805_v5 = vmax.f32 %v2799_v59, 0.0 }
 0x1ad   : > { %v2095_v36 = vpack.i.bf16 %v2802_v15, %v2805_v5  ;;  %v1481_v8 = vpop.permute.xlu1 %1480  ;;  %v1560_v37 = vpop.permute.xlu0 %1559 }
 0x1ae   : > { %v1501_v32 = vsel %vm841_vm0, %v2710_v49, %v1481_v8  ;;  %v1573_v40 = vsel %vm841_vm0, %v2713_v52, %v1560_v37 }
 0x1af   : > { %2096 = vrot.lane.b32.xlu1 %v2095_v36, %s2210_s9  ;;  %2091 = vrot.lane.b32.xlu0 %v2095_v36, %s2207_s16 }
 0x1b1   : > { %v1467_v38 = vpop.permute.xlu1 %1466  ;;  %v1483_v14 = vpop.permute.xlu0 %1482 }
 0x1b2   : > { %v1502_v9 = vsel %vm1344_vm1, %v1501_v32, %v1483_v14  ;;  %v1494_v19 = vsel %vm841_vm0, %v2718_v25, %v1467_v38 }
 0x1b3   : > { %2106 = vrot.lane.b32.xlu1 %v2095_v36, %s2211_s10  ;;  %2101 = vrot.lane.b32.xlu0 %v2095_v36, %s2212_s12  ;;  %s3069_s10 = scalar_lea.hbm %s3116_s5, %s2019_s30  ;;  %s1927_s12 = scalar_lea.sflag [#allocation3], %s215_s25 }
 0x1b5   : > { %v1562_v12 = vpop.permute.xlu1 %1561  ;;  %v1469_v44 = vpop.permute.xlu0 %1468 }
 0x1b6   : > { %v1574_v53 = vsel %vm1344_vm1, %v1573_v40, %v1562_v12  ;;  %v1495_v52 = vsel %vm1344_vm1, %v1494_v19, %v1469_v44 }
 0x1b7   : > { %2116 = vrot.lane.b32.xlu1 %v2095_v36, %s2202_s11  ;;  %2111 = vrot.lane.b32.xlu0 %v2095_v36, %s2213_s13  ;;  %s2133_s13 = scalar_lea.vmem %s3071_s7, 128 }
 0x1b8   : > { %p2134_p11 = scmp.ne.s32.totalorder %s3071_s7, %s2133_s13 }
 0x1b9   : > { %v1485_v33 = vpop.permute.xlu1 %1484  ;;  %v1564_v45 = vpop.permute.xlu0 %1563 }
 0x1ba   : > { %v1503_v49 = vsel %vm1346_vm2, %v1502_v9, %v1485_v33  ;;  %v1575_v16 = vsel %vm1346_vm2, %v1574_v53, %v1564_v45  ;;  %p2135_p12 = pnand %p2134_p11, %p2287_p5 }
 0x1bb   : > { %1727 = vrot.lane.b32.xlu1 %v2805_v5, %s2214_s14  ;;  %2121 = vrot.lane.b32.xlu0 %v2095_v36, %s2215_s15 }
 0x1bc   : > { %p2136_p13 = pneg %p2135_p12 }
 0x1bd   : > { %v1471_v61 = vpop.permute.xlu1 %1470  ;;  %v1487_v47 = vpop.permute.xlu0 %1486 }
 0x1be   : > { %v1496_v25 = vsel %vm1346_vm2, %v1495_v52, %v1471_v61  ;;  %v1504_v48 = vsel %vm1348_vm3, %v1503_v49, %v1487_v47 }
 0x1bf   : > { %1787 = vperm.xlu1 %2089, %v1784_v55   ;;  %1729 = vrot.lane.b32.xlu0 %v2802_v15, %s2214_s14  ;;  %s2137_s14 = sshll.u32 %s2218_s22, 4  ;;  %s2138_s14 = int_to_ptr.vmem [resolvable:$false] %s2137_s14 }
 0x1c0   : > { %s2139_s15 = scalar_lea.vmem %s2138_s14, 256  ;;  %p2140_p0 = scmp.lt.s32.totalorder %s3071_s7, %s2138_s14 }
 0x1c1   : > { %v1566_v10 = vpop.permute.xlu1 %1565  ;;  %v1473_v39 = vpop.permute.xlu0 %1472  ;;  %p2141_p1 = scmp.lt.s32.totalorder %s2139_s15, %s2133_s13 }
 0x1c2   : > { %v1576_v4 = vsel %vm1348_vm3, %v1575_v16, %v1566_v10  ;;  %v1497_v28 = vsel %vm1348_vm3, %v1496_v25, %v1473_v39 }
 0x1c3   : > { %p2142_p2 = por %p2141_p1, %p2140_p0 }
 0x1c5   : > { %v1489_v56 = vpop.permute.xlu1 %1488  ;;  %v1568_v1 = vpop.permute.xlu0 %1567  ;;  %p2143_p3 = pnand %p2142_p2, %p2136_p13 }
 0x1c6   : > { %v1505_v30 = vsel %vm1350_vm4, %v1504_v48, %v1489_v56  ;;  %v1577_v13 = vsel %vm1350_vm4, %v1576_v4, %v1568_v1 }
 0x1c9   : > { %v1475_v60 = vpop.permute.xlu1 %1474  ;;  %v1491_v2 = vpop.permute.xlu0 %1490 }
 0x1ca   : > { %v1498_v34 = vsel %vm1350_vm4, %v1497_v28, %v1475_v60  ;;  %v1506_v3 = vsel %vm1352_vm5, %v1505_v30, %v1491_v2 }
 0x1cd   : > { %v1570_v11 = vpop.permute.xlu1 %1569  ;;  %v1477_v42 = vpop.permute.xlu0 %1476 }
 0x1ce   : > { %v1578_v31 = vsel %vm1352_vm5, %v1577_v13, %v1570_v11  ;;  %v1499_v22 = vsel %vm1352_vm5, %v1498_v34, %v1477_v42  ;;  %vm1610_vm5 = vcmp.lt.s32.totalorder %v2694_v46, 16 }
 0x1d1   : > { %v1493_v17 = vpop.permute.xlu1 %1492  ;;  %v1572_v18 = vpop.permute.xlu0 %1571 }
 0x1d2   : > { %v1507_v20 = vsel %vm1354_vm6, %v1506_v3, %v1493_v17  ;;  %v1579_v21 = vsel %vm1354_vm6, %v1578_v31, %v1572_v18 }
 0x1d3   : > { %vm1588_vm7 = vcmp.ge.s32.totalorder %v1507_v20, 1  ;;  %vm1689_vm8 = vcmp.lt.s32.totalorder %v1507_v20, 15  ;;  %vm1589_vm9 = vcmp.ge.s32.totalorder %v1579_v21, 1  ;;  %vm1634_vm10 = vcmp.lt.s32.totalorder %v1579_v21, 15 }
 0x1d4   : > { %vm2841_vm11 = vmand %vm1689_vm8, %vm1589_vm9  ;;  %v1614_v35 = vsel %vm1588_vm7, 1, %v2200_v7  ;;  %v1658_v0 = vsel %vm1589_vm9, 1, %v2200_v7  ;;  %v1714_v54 = vsel %vm1689_vm8, 1, %v2200_v7  ;;  %v1673_v43 = vsel %vm1634_vm10, 1, %v2200_v7 }
 0x1d5   : > { %v1479_v41 = vpop.permute.xlu1 %1478  ;;  %vm1591_vm12 = vmand %vm1588_vm7, %vm1589_vm9  ;;  %v1622_v57 = vrot.slane %v1614_v35, %v2875_v51  ;;  %v1662_v40 = vrot.slane %v1658_v0, %v2875_v51  ;;  %v1722_v44 = vrot.slane %v1714_v54, %v2875_v51  ;;  %v1677_v49 = vrot.slane %v1673_v43, %v2875_v51 }
 0x1d6   : > { %v1500_v29 = vsel %vm1354_vm6, %v1499_v22, %v1479_v41  ;;  %vm2850_vm13 = vmand %vm1588_vm7, %vm1634_vm10  ;;  %v1593_v27 = vsel %vm1591_vm12, 1, %v2200_v7  ;;  %vm1655_vm6 = vcmp.lt.s32.totalorder %v2694_v46, 1  ;;  %vm1584_vm7 = vcmp.lt.s32.totalorder %v2694_v46, 17 }
 0x1d7   : > { %vm1587_vm14 = vcmp.ge.s32.totalorder %v1500_v29, 1  ;;  %vm1688_vm15 = vcmp.lt.s32.totalorder %v1500_v29, 15  ;;  %vm2856_vm0 = vmand %vm1689_vm8, %vm1634_vm10  ;;  %v1638_v37 = vsel %vm2850_vm13, 1, %v2200_v7  ;;  %v1601_v32 = vrot.slane %v1593_v27, %v2875_v51 }
 0x1d8   : > { %vm1590_vm1 = vmand %vm1587_vm14, %vm1589_vm9  ;;  %v1613_v26 = vsel %vm1587_vm14, 1, %v2200_v7  ;;  %v2897_v14 = vsel %vm1688_vm15, 1, %v2200_v7  ;;  %vm1631_vm8 = vcmp.lt.s32.totalorder %v2694_v46, 15  ;;  %v1646_v9 = vrot.slane %v1638_v37, %v2875_v51 }
 0x1d9   : > { %vm1635_vm2 = vmand %vm1587_vm14, %vm1634_vm10  ;;  %v1592_v36 = vsel %vm1590_vm1, 1, %v2200_v7  ;;  %v1618_v38 = vrot.slane %v1613_v26, %v2875_v51  ;;  %v1718_v45 = vrot.slane %v2897_v14, %v2875_v51  ;;  %v2923_v16 = vsel %vm2841_vm11, 1, %v2200_v7 }
 0x1da   : > { %vm2864_vm3 = vmand %vm1688_vm15, %vm1589_vm9  ;;  %v1637_v8 = vsel %vm1635_vm2, 1, %v2200_v7  ;;  %v1597_v53 = vrot.slane %v1592_v36, %v2875_v51  ;;  %vm2913_vm9 = vcmp.eq.s32.totalorder %v1622_v57, 1  ;;  %vm2937_vm1 = vcmp.eq.s32.totalorder %v1662_v40, 1 }
 0x1db   : > { %vm2870_vm4 = vmand %vm1688_vm15, %vm1634_vm10  ;;  %v2904_v12 = vsel %vm2864_vm3, 1, %v2200_v7  ;;  %v1642_v19 = vrot.slane %v1637_v8, %v2875_v51  ;;  %vm1774_vm10 = vcmask 1043456   ;;  %vm2925_vm12 = vcmp.eq.s32.totalorder %v1618_v38, 1 }
 0x1dc   : > { %v1697_v55 = vrot.slane %v2904_v12, %v2875_v51  ;;  %vm2933_vm15 = vcmp.eq.s32.totalorder %v1601_v32, 1  ;;  %vm2941_vm11 = vcmp.eq.s32.totalorder %v1646_v9, 1  ;;  %vm2945_vm2 = vcmp.eq.s32.totalorder %v1597_v53, 1 }
 0x1dd   : > { %vm2949_vm3 = vcmp.eq.s32.totalorder %v1642_v19, 1  ;;  %v1701_v13 = vrot.slane %v2923_v16, %v2875_v51  ;;  %vm2963_vm14 = vcmp.eq.s32.totalorder %v1677_v49, 1  ;;  %vm2967_vm13 = vcmp.eq.s32.totalorder %v1722_v44, 1 }
 0x1de   : > { %v1737_v56 = vsel %vm2856_vm0, 1, %v2200_v7  ;;  %vm1731_vm0 = vcmp.lt.s32.totalorder %v2694_v46, 111  ;;  %v1736_v12 = vsel %vm2870_vm4, 1, %v2200_v7 }
 0x221   : > { %v2092_v61 = vpop.permute.xlu0 %2091  ;;  %v2097_v47 = vpop.permute.xlu1 %2096 }
 0x222   : > { %v2094_v10 = vunpack.i.h.bf16 %v2092_v61  ;;  %v2093_v39 = vunpack.i.l.bf16 %v2092_v61  ;;  %v2099_v4 = vunpack.i.h.bf16 %v2097_v47  ;;  %v2098_v28 = vunpack.i.l.bf16 %v2097_v47 }
 0x224   : > { %v1611_v60 = vsel %vm1610_vm5, %v2093_v39, %v2094_v10  ;;  %v1612_v2 = vsel %vm1610_vm5, %v2094_v10, %v2093_v39  ;;  %v1656_v34 = vsel %vm1655_vm6, %v2098_v28, %v2099_v4  ;;  %v1657_v3 = vsel %vm1655_vm6, %v2099_v4, %v2098_v28 }
 0x225   : > { %v2102_v31 = vpop.permute.xlu0 %2101  ;;  %v2107_v22 = vpop.permute.xlu1 %2106  ;;  %v1626_v17 = vsel %vm2913_vm9, %v1611_v60, 0.0  ;;  %v1665_v18 = vsel %vm2937_vm1, %v1656_v34, 0.0  ;;  %v1625_v20 = vsel %vm2925_vm12, %v1612_v2, 0.0  ;;  %v1664_v21 = vsel %vm2937_vm1, %v1657_v3, 0.0 }
 0x226   : > { %v2104_v63 = vunpack.i.h.bf16 %v2102_v31  ;;  %v2103_v41 = vunpack.i.l.bf16 %v2102_v31  ;;  %v2109_v29 = vunpack.i.h.bf16 %v2107_v22  ;;  %v2108_v24 = vunpack.i.l.bf16 %v2107_v22 }
 0x227   : > { %vm1685_vm5 = vcmp.lt.s32.totalorder %v2694_v46, 113  ;;  %v1753_v23 = vrot.slane %v1626_v17, 4  ;;  %v1759_v35 = vrot.slane %v1665_v18, 4  ;;  %v1752_v26 = vrot.slane %v1625_v20, 4 }
 0x228   : > { %v1758_v27 = vrot.slane %v1664_v21, 4  ;;  %v1585_v0 = vsel %vm1584_vm7, %v2103_v41, %v2104_v63  ;;  %v1632_v54 = vsel %vm1631_vm8, %v2108_v24, %v2109_v29  ;;  %v1586_v43 = vsel %vm1584_vm7, %v2104_v63, %v2103_v41 }
 0x229   : > { %v1633_v57 = vsel %vm1631_vm8, %v2109_v29, %v2108_v24  ;;  %v2112_v36 = vpop.permute.xlu0 %2111  ;;  %v2117_v8 = vpop.permute.xlu1 %2116  ;;  %v1605_v37 = vsel %vm2933_vm15, %v1585_v0, 0.0  ;;  %v1650_v38 = vsel %vm2941_vm11, %v1632_v54, 0.0  ;;  %v1604_v32 = vsel %vm2945_vm2, %v1586_v43, 0.0 }
 0x22a   : > { %v1649_v40 = vsel %vm2949_vm3, %v1633_v57, 0.0  ;;  %v2114_v44 = vunpack.i.h.bf16 %v2112_v36  ;;  %v2113_v9 = vunpack.i.l.bf16 %v2112_v36  ;;  %v2119_v53 = vunpack.i.h.bf16 %v2117_v8 }
 0x22b   : > { %v2118_v19 = vunpack.i.l.bf16 %v2117_v8  ;;  %v1776_v33 = vsel %vm1774_vm10, %v1605_v37, %v1753_v23  ;;  %v1778_v49 = vsel %vm1774_vm10, %v1650_v38, %v1759_v35  ;;  %v1775_v16 = vsel %vm1774_vm10, %v1604_v32, %v1752_v26 }
 0x22c   : > { %v1777_v52 = vsel %vm1774_vm10, %v1649_v40, %v1758_v27  ;;  %vm3147_vm6 = vcmp.lt.s32.totalorder %v2694_v46, 127  ;;  %vm3149_vm8 = vcmp.lt.s32.totalorder %v2694_v46, 112  ;;  %vm3011_vm12 = vcmp.eq.s32.totalorder %v1718_v45, 1 }
 0x22d   : > { %v1671_v61 = vsel %vm3147_vm6, %v2113_v9, %v2114_v44  ;;  %vm3148_vm7 = vmmov %vm3147_vm6  ;;  %v1711_v25 = vsel %vm3149_vm8, %v2118_v19, %v2119_v53  ;;  %v2122_v28 = vpop.permute.xlu0 %2121  ;;  %v2020_v34 = vpack.c.bf16 %v1778_v49, %v1776_v33  ;;  %v2022_v3 = vpack.c.bf16 %v1777_v52, %v1775_v16  ;;  %v1728_v20 = vpop.permute.xlu1 %1727 }
 0x22e   : > { %v1672_v47 = vsel %vm3148_vm7, %v2114_v44, %v2113_v9  ;;  %vm3150_vm9 = vmmov %vm3149_vm8  ;;  %v1679_v39 = vsel %vm2963_vm14, %v1671_v61, 0.0  ;;  %v1725_v14 = vsel %vm3011_vm12, %v1711_v25, 0.0  ;;  %v2124_v60 = vunpack.i.h.bf16 %v2122_v28 }
 0x22f   : > { %v1712_v48 = vsel %vm3150_vm9, %v2119_v53, %v2118_v19  ;;  %v1680_v4 = vsel %vm2963_vm14, %v1672_v47, 0.0  ;;  %v1764_v1 = vrot.slane %v1679_v39, 4  ;;  %v2123_v2 = vunpack.i.l.bf16 %v2122_v28  ;;  %2021 = vmatprep.subr.bf16.mxu0 %v2020_v34 }
 0x230   : > { %v1765_v30 = vrot.slane %v1680_v4, 4  ;;  %v1726_v45 = vsel %vm2967_vm13, %v1712_v48, 0.0  ;;  %vm3029_vm14 = vcmp.eq.s32.totalorder %v1697_v55, 1  ;;  %vm1703_vm15 = vcmp.eq.s32.totalorder %v1701_v13, 1  ;;  %2023 = vmatpush1.bf16.msra.mxu0 %v2022_v3 }
 0x231   : > { %v1770_v50 = vrot.slane %v1725_v14, 4  ;;  %v1771_v31 = vrot.slane %v1726_v45, 4  ;;  %v1686_v42 = vsel %vm1685_vm5, %v2123_v2, %v2124_v60  ;;  %v1687_v22 = vsel %vm1685_vm5, %v2124_v60, %v2123_v2  ;;  %v1730_v17 = vpop.permute.xlu0 %1729 }
 0x232   : > { %v1745_v55 = vrot.slane %v1737_v56, %v2875_v51  ;;  %v1705_v18 = vsel %vm1703_vm15, %v1687_v22, 0.0  ;;  %v1704_v13 = vsel %vm3029_vm14, %v1686_v42, 0.0  ;;  %v1780_v21 = vsel %vm1774_vm10, %v2802_v15, %v1765_v30 }
 0x233   : > { %v1782_v63 = vsel %vm1774_vm10, %v1705_v18, %v1771_v31  ;;  %v1779_v41 = vsel %vm1774_vm10, %v2805_v5, %v1764_v1  ;;  %v1781_v29 = vsel %vm1774_vm10, %v1704_v13, %v1770_v50  ;;  %v1733_v7 = vsel %vm1731_vm0, %v1730_v17, %v1728_v20  ;;  %v1783_v5 = vld [vmem:[%s3114_s3] sm:$0xf] }
 0x234   : > { %v2024_v62 = vpack.c.bf16 %v1782_v63, %v1780_v21  ;;  %v2026_v24 = vpack.c.bf16 %v1781_v29, %v1779_v41  ;;  %v1741_v23 = vrot.slane %v1736_v12, %v2875_v51  ;;  %vm1747_vm4 = vcmp.eq.s32.totalorder %v1745_v55, 1 }
 0x235   : > { %v1732_v35 = vsel %vm1731_vm0, %v1728_v20, %v1730_v17  ;;  %v1749_v15 = vsel %vm1747_vm4, %v1733_v7, 0.0  ;;  %vm1790_vm1 = vcmask 293888   ;;  %v2216_v51 = vmov 1966171168  }
 0x236   : > { %2025 = vmatprep.subr.bf16.mxu0 %v2024_v62  ;;  %vm1746_vm13 = vcmp.eq.s32.totalorder %v1741_v23, 1  ;;  %v1877_v27 = vunpack.c.l.s4 %v2216_v51  ;;  %v2217_v40 = vmov 1935823168  }
 0x237   : > { %2027 = vmatpush1.bf16.msra.mxu0 %v2026_v24  ;;  %v1748_v26 = vsel %vm1746_vm13, %v1732_v35, 0.0  ;;  %v1903_v44 = vunpack.c.l.s4 %v2217_v40 }
 0x238   : > { %2009 = vmatprep.subr.msk.mxu0 %vm1774_vm10, %v1749_v15  ;;  %v1878_v54 = vunpack.c.0.s8 %v1877_v27 }
 0x239   : > { %v1904_v33 = vunpack.c.0.s8 %v1903_v44 }
 0x23a   : > { %v1881_v38 = vsub.s32 %v1878_v54, %v2301_v6 }
 0x23b   : > { %2010 = vmatpush1.msk.msra.mxu0 %vm1774_vm10, %v1748_v26 }
 0x23c   : > { %2011 = vmatmul.mubr.msk.f32.vlgmr.msra.gmra.mrb[0].mxu0 %vm1790_vm1, %v1783_v5 }
 0x23e   : > { %v1788_v0 = vpop.permute.xlu1 %1787 }
 0x30f   : > { %v1866_v46 = vpop.f32.mrb[0].mxu0 }
 0x310   : > { %v1867_v43 = vadd.f32 %v1866_v46, %v1788_v0  ;;  %v1868_v57 = vpop.f32.mrb[1].mxu0 }
 0x311   : > { %v1869_v36 = vadd.f32 %v1868_v57, %v1788_v0 }
 0x312   : > { %v1871_v8 = vadd.f32 %v1867_v43, %v2799_v59  ;;  %v1907_v59 = vsub.s32 %v1904_v33, %v2301_v6 }
 0x313   : > { %v1872_v37 = vadd.f32 %v1869_v36, %v2796_v58 }
 0x315   : > { %v1875_v32 = vcombine.low %v1871_v8, %v1872_v37 }
 0x317   : > { %v1882_v9 = vrot.slane %v1875_v32, %v1881_v38 }
 0x319   : > { %v1883_v53 = vcombine.high %v1882_v9, %v1882_v9  ;;  %v1890_v19 = vrot.slane %v1882_v9, %v1881_v38 }
 0x31b   : > { %v1897_v49 = vrot.slane %v1883_v53, %v1881_v38  ;;  %v1898_v16 = vcombine.high %v1890_v19, %v1890_v19 }
 0x31d   : > { %v1899_v52 = vcombine.high %v1897_v49, %v1897_v49  ;;  %v1900_v61 = vcombine.low %v1890_v19, %v1898_v16 }
 0x31f   : > { %v1901_v58 = vcombine.low %v1897_v49, %v1899_v52  ;;  %v1908_v47 = vrot.slane %v1900_v61, %v1907_v59 }
 0x321   : > { %v1915_v25 = vrot.slane %v1901_v58, %v1907_v59 }
 0x323   : > { %v1916_v48 = vcombine.low %v1908_v47, %v1915_v25 }
 0x325   : > { %2012 = vst.sshfl [vmem:[%s217_s6] sm:$0xff pattern:$0x75316420] %v1916_v48 }
 0x326   : > { %2146 = shalt.err (!%p2143_p3)
}
 0x327   : > { %s2147_s11 = scalar_lea.hbm %s3069_s10, 128  ;;  %s2151_s23 = scalar_lea.hbm %s3116_s5, 256 }
 0x328   : > { %p2148_p4 = scmp.ne.s32.totalorder %s3069_s10, %s2147_s11  ;;  %p2152_p9 = scmp.lt.u32.totalorder %s3069_s10, %s3116_s5 }
 0x329   : > { %p2153_p10 = scmp.lt.u32.totalorder %s2151_s23, %s2147_s11  ;;  %p2155_p12 = scmp.lt.u32.totalorder %s2147_s11, %s3069_s10 }
 0x32a   : > { %p2149_p7 = pnand %p2148_p4, %p2287_p5 }
 0x32b   : > { %p2154_p11 = por %p2153_p10, %p2152_p9 }
 0x32c   : > { %p2150_p8 = pneg %p2149_p7 }
 0x32d   : > { %p2156_p13 = por %p2155_p12, %p2154_p11 }
 0x32f   : > { %p2157_p0 = pnand %p2156_p13, %p2150_p8 }
 0x331   : > { %2160 = shalt.err (!%p2157_p0)
}
 0x332   : > { %2028 = dma.vmem_to_hbm [thread:$0]  (%p2287_p5), %s3071_s7, 128, %s3069_s10, %s1927_s12  }
 0x333 PF: > { %p2034_p1 = scmp.ge.s32.totalorder %s2195_s21, 2  ;;  %s1953_s30 = sand.u32 1, %s2183_s18  }
 0x334   : > { %s1954_s6 = scalar_lea.sflag [#allocation3], %s1953_s30 }
 0x335   : > { %p2031_p2 = pnand %p2034_p1, %p2291_p6 }
 0x337   : > { %2178 = dma.done.wait (!%p2031_p2), %s1954_s6, 128  }
 0x338   : > { %2180 = vsyncadd (!%p2031_p2), %s1954_s6, 4294967168  ;;  %p15_p3 = scmp.ge.s32.totalorder %s2274_s24, 4   ;;  %s3155_s18 = smov %s2187_s19 }
 0x339   : > { %s3156_s19 = smov %s2191_s20  ;;  %s3157_s20 = smov %s2285_s27 }
 0x33a   : > { %s3158_s21 = smov %s2274_s24  ;;  %17 = sbr.rel (!%p15_p3) target bundleno = 3 (0x3), region = 75 }
 0x341   :  { %1959 = vsyncpa [#allocation3], 1 }
 0x342   :  { %1961 = vsyncpa [#allocation3 + $0x1], 1 }

</bundles_post_ra>
